<compile_context>
chip_gen: v6e
topology: v6e:2x2x1
jax: 0.10.0
libtpu: 0.0.40
codegen_flags: <defaults>
</compile_context>

<pallas_src>
import functools
import math

import jax
import jax.numpy as jnp
from jax.experimental import pallas as pl
from jax.experimental.pallas import tpu as pltpu

_LN_EPS = 1e-5  # matches torch.nn.LayerNorm default

# Rows of the stacked weight tensor (10, E, E); host-transposed to (in, out),
# bf16, with 1/sqrt(head_dim) folded into the q-projection rows.
W_SQ, W_SK, W_SV, W_SO, W_CQ, W_CK, W_CV, W_CO, W_F1, W_F2 = range(10)
# Rows of the stacked vector tensor (16, E) f32 (biases + LayerNorm params).
(V_BSQ, V_BSK, V_BSV, V_BSO, V_G1, V_B1,
 V_BCQ, V_BCK, V_BCV, V_BCO, V_G2, V_B2,
 V_BF1, V_BF2, V_G3, V_B3) = range(16)


def _layernorm(x, gamma, beta, eps=_LN_EPS):
    mean = jnp.mean(x, axis=-1, keepdims=True)
    var = jnp.mean(jnp.square(x - mean), axis=-1, keepdims=True)
    return (x - mean) * jax.lax.rsqrt(var + eps) * gamma + beta


def _split_heads_to_hsd(x_f32, num_heads):
    """(S, E) f32 -> (H, S, D) bf16.  Runs once per batch (query tile 0)."""
    s, e = x_f32.shape
    d = e // num_heads
    return jnp.transpose(x_f32.reshape(s, num_heads, d), (1, 0, 2)).astype(
        jnp.bfloat16)


def _attend(q_f32, k_hsd, v_hsd, num_heads):
    """q: (Tq, E) f32 (scale pre-folded); k/v: (H, S, D) bf16 -> (Tq, E) f32."""
    tq, e = q_f32.shape
    d = e // num_heads
    qh = jnp.transpose(q_f32.reshape(tq, num_heads, d), (1, 0, 2)).astype(
        jnp.bfloat16)                                            # (H, Tq, D)
    # Scores (H, Tq, S): H batched, D contracted (leading batch dims -> MXU).
    s = jax.lax.dot_general(
        qh, k_hsd, (((2,), (2,)), ((0,), (0,))),
        preferred_element_type=jnp.float32)
    s = s - jnp.max(s, axis=-1, keepdims=True)
    p = jnp.exp(s)
    # EUP reciprocal (free slot); set approx=False for exact parity with torch.
    p = p * pl.reciprocal(jnp.sum(p, axis=-1, keepdims=True), approx=True)
    # (H, Tq, D): H batched, S contracted.
    o = jax.lax.dot_general(
        p.astype(jnp.bfloat16), v_hsd, (((2,), (1,)), ((0,), (0,))),
        preferred_element_type=jnp.float32)
    return jnp.transpose(o, (1, 0, 2)).reshape(tq, e)


def decoder_layer_kernel(
    xq_ref,    # (1, Tq, E) f32  query tile / residual stream
    xkv_ref,   # (1, S,  E) bf16 full x (self-attn K/V source)
    enc_ref,   # (1, Se, E) bf16 encoder output (cross-attn K/V source)
    w_ref,     # (10, E, E) bf16 stacked weights, (in, out) layout
    vec_ref,   # (16, E)   f32  stacked biases + LayerNorm gamma/beta
    o_ref,     # (1, Tq, E)
    ks_ref, vs_ref,   # (H, S,  D) bf16 scratch — cached self-attn K/V
    kc_ref, vc_ref,   # (H, Se, D) bf16 scratch — cached cross-attn K/V
    *,
    num_heads: int,
):
    def project(x_bf16, wi, bi):
        # y = x @ W + b   (bf16 x bf16 -> f32 accumulation)
        return (jnp.dot(x_bf16, w_ref[wi], preferred_element_type=jnp.float32)
                + vec_ref[bi])

    # ---- K/V projections: computed once per batch (q tile 0), kept in VMEM ---
    @pl.when(pl.program_id(1) == 0)
    def _():
        xkv = xkv_ref[0]   # (S, E)  bf16
        enc = enc_ref[0]   # (Se, E) bf16
        ks_ref[...] = _split_heads_to_hsd(project(xkv, W_SK, V_BSK), num_heads)
        vs_ref[...] = _split_heads_to_hsd(project(xkv, W_SV, V_BSV), num_heads)
        kc_ref[...] = _split_heads_to_hsd(project(enc, W_CK, V_BCK), num_heads)
        vc_ref[...] = _split_heads_to_hsd(project(enc, W_CV, V_BCV), num_heads)

    xq = xq_ref[0]                       # (Tq, E) f32 residual stream
    xq_b = xq.astype(jnp.bfloat16)

    # ---- self attention (queries = this tile, K/V = cached full sequence) ----
    q = project(xq_b, W_SQ, V_BSQ)
    attn = _attend(q, ks_ref[...], vs_ref[...], num_heads)
    attn = project(attn.astype(jnp.bfloat16), W_SO, V_BSO)
    h1 = _layernorm(xq + attn, vec_ref[V_G1], vec_ref[V_B1])   # dropout_1 == id

    # ---- cross attention (K/V = cached encoder memory) ----------------------
    q2 = project(h1.astype(jnp.bfloat16), W_CQ, V_BCQ)
    xattn = _attend(q2, kc_ref[...], vc_ref[...], num_heads)
    xattn = project(xattn.astype(jnp.bfloat16), W_CO, V_BCO)
    h2 = _layernorm(h1 + xattn, vec_ref[V_G2], vec_ref[V_B2])

    # ---- feed-forward: Linear(E,E) -> ReLU -> Linear(E,E) -------------------
    f = project(h2.astype(jnp.bfloat16), W_F1, V_BF1)
    f = jnp.maximum(f, 0.0)
    f = project(f.astype(jnp.bfloat16), W_F2, V_BF2)
    h3 = _layernorm(h2 + f, vec_ref[V_G3], vec_ref[V_B3])

    o_ref[0] = h3.astype(o_ref.dtype)


def _physical_vmem_bytes():
    """Physical VMEM per TensorCore; robust fallbacks (64 MiB v7x, 128 otherwise)."""
    try:
        info = pltpu.get_tpu_info()
        for attr in ("vmem_capacity_bytes", "vmem_size_bytes", "vmem_bytes"):
            v = getattr(info, attr, None)
            if v:
                return int(v)
    except Exception:
        pass
    try:
        kind = jax.devices()[0].device_kind.lower()
        if "v7" in kind or "7x" in kind:
            return 64 * 1024 * 1024
    except Exception:
        pass
    return 128 * 1024 * 1024


def _pick_q_tile(S, kv_len, num_heads, vmem_budget):
    """Largest multiple-of-8 divisor of S that keeps the transient (H,Tq,S) f32
    score block (x2 for the exp copy) under ~1/4 of the VMEM budget, capped at
    128 on 64-MiB parts (v7x) and 512 on 128-MiB parts (v5e/v6e)."""
    cap_scores = vmem_budget // max(1, 32 * num_heads * kv_len)
    hard_cap = 128 if vmem_budget <= 72 * 1024 * 1024 else 512
    max_tile = max(8, min(hard_cap, (cap_scores // 8) * 8))
    if S <= max_tile:
        return S
    for t in range(max_tile, 7, -8):
        if S % t == 0:
            return t
    # TODO(synk): for awkward S (no multiple-of-8 divisor <= max_tile) pad S or
    # stream K/V with an online softmax instead of a full-sequence tile.
    return S


def _cost_estimate(B, S, Se, E, H, x, enc, w_stack, vec_stack):
    proj = 2 * E * E                        # flops per projected row
    flops_per_batch = (
        (S + Se) * 2 * proj                 # self + cross K/V projections (once)
        + 3 * S * proj                      # self-q, self-out, cross-q
        + S * proj                          # cross-out
        + 2 * S * proj                      # FFN
        + 4 * S * S * E                     # self scores + attn@V
        + 4 * S * Se * E                    # cross scores + attn@V
    )
    transcendentals = B * H * S * (S + Se)  # softmax exps
    bytes_accessed = int(
        x.size * x.dtype.itemsize           # f32 query tiles
        + x.size * 2 + enc.size * 2         # bf16 K/V source blocks (once/batch)
        + x.size * x.dtype.itemsize         # output
        + w_stack.size * w_stack.dtype.itemsize
        + vec_stack.size * vec_stack.dtype.itemsize
    )
    return pl.CostEstimate(flops=int(B * flops_per_batch),
                           transcendentals=int(transcendentals),
                           bytes_accessed=bytes_accessed)


def decoder_layer(x, enc_output, params, num_heads, *, q_tile=None,
                  vmem_limit_bytes=None):
    B, S, E = x.shape
    Be, Se, Ee = enc_output.shape
    assert Be == B and Ee == E and E % num_heads == 0
    D = E // num_heads

    phys_vmem = _physical_vmem_bytes()
    if vmem_limit_bytes is None:
        # ~85% of physical VMEM leaves headroom for compiler-internal scratch.
        vmem_limit_bytes = int(phys_vmem * 0.85)
    if q_tile is None:
        q_tile = _pick_q_tile(S, max(S, Se), num_heads, vmem_limit_bytes)
    assert S % q_tile == 0
    n_q = S // q_tile

    w_stack = params["w_stack"]      # (10, E, E) bf16
    vec_stack = params["vec_stack"]  # (16, E)   f32

    # bf16 copies of the K/V sources: cast once on the host (not every tile)
    # and halve the resident VMEM of the full-sequence blocks.
    x_kv = x.astype(jnp.bfloat16)
    enc_kv = enc_output.astype(jnp.bfloat16)

    kernel = functools.partial(decoder_layer_kernel, num_heads=num_heads)

    grid_spec = pltpu.PrefetchScalarGridSpec(
        num_scalar_prefetch=0,
        grid=(B, n_q),
        in_specs=[
            pl.BlockSpec((1, q_tile, E), lambda b, q: (b, q, 0)),
            # Block index constant across the inner q axis -> single-buffered.
            pl.BlockSpec((1, S, E), lambda b, q: (b, 0, 0),
                         pipeline_mode=pl.Buffered(1)),
            pl.BlockSpec((1, Se, E), lambda b, q: (b, 0, 0),
                         pipeline_mode=pl.Buffered(1)),
            pl.BlockSpec((10, E, E), lambda b, q: (0, 0, 0),
                         pipeline_mode=pl.Buffered(1)),
            pl.BlockSpec((16, E), lambda b, q: (0, 0),
                         pipeline_mode=pl.Buffered(1)),
        ],
        out_specs=pl.BlockSpec((1, q_tile, E), lambda b, q: (b, q, 0)),
        scratch_shapes=[
            pltpu.VMEM((num_heads, S, D), jnp.bfloat16),    # self K
            pltpu.VMEM((num_heads, S, D), jnp.bfloat16),    # self V
            pltpu.VMEM((num_heads, Se, D), jnp.bfloat16),   # cross K
            pltpu.VMEM((num_heads, Se, D), jnp.bfloat16),   # cross V
        ],
    )

    return pl.pallas_call(
        kernel,
        out_shape=jax.ShapeDtypeStruct((B, S, E), x.dtype),
        grid_spec=grid_spec,
        compiler_params=pltpu.CompilerParams(
            # K/V scratch is carried across the q axis -> "arbitrary";
            # batch stays "parallel" for megacore sharding.
            dimension_semantics=("parallel", "arbitrary"),
            vmem_limit_bytes=int(vmem_limit_bytes),
        ),
        cost_estimate=_cost_estimate(B, S, Se, E, num_heads,
                                     x, enc_output, w_stack, vec_stack),
    )(x, x_kv, enc_kv, w_stack, vec_stack)


def init_torch_params(key, embed_size):
    """Parameters in PyTorch layout: in_proj (3E,E)/(3E,), out_proj (E,E)/(E,)."""
    E = embed_size
    ks = jax.random.split(key, 10)
    s = 0.02
    n = lambda k, shape: jax.random.normal(k, shape, jnp.float32) * s
    return {
        "self_in_proj_w": n(ks[0], (3 * E, E)),
        "self_in_proj_b": n(ks[1], (3 * E,)),
        "self_out_proj_w": n(ks[2], (E, E)),
        "self_out_proj_b": n(ks[3], (E,)),
        "norm1_g": jnp.ones((E,), jnp.float32),
        "norm1_b": jnp.zeros((E,), jnp.float32),
        "cross_in_proj_w": n(ks[4], (3 * E, E)),
        "cross_in_proj_b": n(ks[5], (3 * E,)),
        "cross_out_proj_w": n(ks[6], (E, E)),
        "cross_out_proj_b": n(ks[7], (E,)),
        "norm2_g": jnp.ones((E,), jnp.float32),
        "norm2_b": jnp.zeros((E,), jnp.float32),
        "ffn_w1": n(ks[8], (E, E)),
        "ffn_b1": jnp.zeros((E,), jnp.float32),
        "ffn_w2": n(ks[9], (E, E)),
        "ffn_b2": jnp.zeros((E,), jnp.float32),
        "norm3_g": jnp.ones((E,), jnp.float32),
        "norm3_b": jnp.zeros((E,), jnp.float32),
    }


def prepare_params(p, embed_size, num_heads, weight_dtype=jnp.bfloat16):
    """Host-side layout plumbing: split packed in_proj into q/k/v, transpose all
    W to (in, out), fold 1/sqrt(head_dim) into the q projection, and pack
    everything into two stacked arrays (weights bf16, vectors f32)."""
    E = embed_size
    D = E // num_heads
    scale = 1.0 / math.sqrt(D)

    def wT(mat):  # torch (out, in) -> (in, out)
        return jnp.asarray(mat, jnp.float32).T

    sq, sk, sv = jnp.split(p["self_in_proj_w"], 3, axis=0)
    sbq, sbk, sbv = jnp.split(p["self_in_proj_b"], 3, axis=0)
    cq, ck, cv = jnp.split(p["cross_in_proj_w"], 3, axis=0)
    cbq, cbk, cbv = jnp.split(p["cross_in_proj_b"], 3, axis=0)

    w_stack = jnp.stack([
        wT(sq) * scale, wT(sk), wT(sv), wT(p["self_out_proj_w"]),
        wT(cq) * scale, wT(ck), wT(cv), wT(p["cross_out_proj_w"]),
        wT(p["ffn_w1"]), wT(p["ffn_w2"]),
    ], axis=0).astype(weight_dtype)                      # (10, E, E)

    vec_stack = jnp.stack([
        sbq * scale, sbk, sbv, p["self_out_proj_b"],
        p["norm1_g"], p["norm1_b"],
        cbq * scale, cbk, cbv, p["cross_out_proj_b"],
        p["norm2_g"], p["norm2_b"],
        p["ffn_b1"], p["ffn_b2"],
        p["norm3_g"], p["norm3_b"],
    ], axis=0).astype(jnp.float32)                       # (16, E)

    return {"w_stack": w_stack, "vec_stack": vec_stack}


def _reference_decoder_layer(x, enc, p, num_heads, eps=_LN_EPS):
    """Pure-JAX f32 reference mirroring torch semantics (dropout = identity)."""
    E = x.shape[-1]
    D = E // num_heads

    def ln(t, g, b):
        m = jnp.mean(t, -1, keepdims=True)
        v = jnp.mean(jnp.square(t - m), -1, keepdims=True)
        return (t - m) / jnp.sqrt(v + eps) * g + b

    def mha(query, kv, in_w, in_b, out_w, out_b):
        wq, wk, wv = jnp.split(in_w, 3, axis=0)
        bq, bk, bv = jnp.split(in_b, 3, axis=0)
        q = query @ wq.T + bq
        k = kv @ wk.T + bk
        v = kv @ wv.T + bv
        Bq, Sq, _ = query.shape
        Sk = kv.shape[1]
        sh = lambda t, L: t.reshape(Bq, L, num_heads, D).transpose(0, 2, 1, 3)
        qh, kh, vh = sh(q, Sq), sh(k, Sk), sh(v, Sk)
        s = jnp.einsum("bhqd,bhkd->bhqk", qh, kh) / math.sqrt(D)
        pr = jax.nn.softmax(s, axis=-1)
        o = jnp.einsum("bhqk,bhkd->bhqd", pr, vh)
        o = o.transpose(0, 2, 1, 3).reshape(Bq, Sq, E)
        return o @ out_w.T + out_b

    a = mha(x, x, p["self_in_proj_w"], p["self_in_proj_b"],
            p["self_out_proj_w"], p["self_out_proj_b"])
    h1 = ln(x + a, p["norm1_g"], p["norm1_b"])
    c = mha(h1, enc, p["cross_in_proj_w"], p["cross_in_proj_b"],
            p["cross_out_proj_w"], p["cross_out_proj_b"])
    h2 = ln(h1 + c, p["norm2_g"], p["norm2_b"])
    f = jnp.maximum(h2 @ p["ffn_w1"].T + p["ffn_b1"], 0.0)
    f = f @ p["ffn_w2"].T + p["ffn_b2"]
    return ln(h2 + f, p["norm3_g"], p["norm3_b"])


if __name__ == "__main__":
    B, S, S_enc, E, H = 2, 8, 8, 32, 4

    root = jax.random.PRNGKey(0)
    k_x, k_e, k_p = jax.random.split(root, 3)
    x = jax.random.normal(k_x, (B, S, E), jnp.float32)
    enc = jax.random.normal(k_e, (B, S_enc, E), jnp.float32)

    torch_style = init_torch_params(k_p, E)
    params = prepare_params(torch_style, E, H)

    out = decoder_layer(x, enc, params, num_heads=H)
    out = jax.block_until_ready(out)
    assert out.shape == (B, S, E)
    assert bool(jnp.all(jnp.isfinite(out)))

    # Loose tolerance: bf16 matmul inputs + approx softmax reciprocal.
    ref = _reference_decoder_layer(x, enc, torch_style, H)
    assert jnp.allclose(out, ref, atol=5e-2, rtol=5e-2), float(
        jnp.max(jnp.abs(out - ref)))

    print("KERNEL_OK")
</pallas_src>

<mosaic_0001>
module attributes {stable_mosaic.version = 11 : i64} {
  func.func @decoder_layer_kernel(%arg0: i32, %arg1: i32, %arg2: memref<1x8x32xf32, #tpu.memory_space<vmem>>, %arg3: memref<1x8x32xbf16, #tpu.memory_space<vmem>>, %arg4: memref<1x8x32xbf16, #tpu.memory_space<vmem>>, %arg5: memref<10x32x32xbf16, #tpu.memory_space<vmem>>, %arg6: memref<16x32xf32, #tpu.memory_space<vmem>>, %arg7: memref<1x8x32xf32, #tpu.memory_space<vmem>>, %arg8: memref<4x8x8xbf16, #tpu.memory_space<vmem>>, %arg9: memref<4x8x8xbf16, #tpu.memory_space<vmem>>, %arg10: memref<4x8x8xbf16, #tpu.memory_space<vmem>>, %arg11: memref<4x8x8xbf16, #tpu.memory_space<vmem>>) attributes {dimension_semantics = [#tpu.dimension_semantics<parallel>, #tpu.dimension_semantics<arbitrary>], iteration_bounds = array<i64: 2, 1>, scalar_prefetch = 0 : i64, scratch_operands = 4 : i64, tpu.core_type = #tpu.core_type<tc>, window_params = [{transform_indices = @transform_0, window_bounds = array<i64: 1, 8, 32>}, {pipeline_mode = #tpu.pipeline_mode<synchronous>, transform_indices = @transform_1, window_bounds = array<i64: 1, 8, 32>}, {pipeline_mode = #tpu.pipeline_mode<synchronous>, transform_indices = @transform_2, window_bounds = array<i64: 1, 8, 32>}, {pipeline_mode = #tpu.pipeline_mode<synchronous>, transform_indices = @transform_3, window_bounds = array<i64: 10, 32, 32>}, {pipeline_mode = #tpu.pipeline_mode<synchronous>, transform_indices = @transform_4, window_bounds = array<i64: 16, 32>}, {transform_indices = @transform_5, window_bounds = array<i64: 1, 8, 32>}]} {
    %c0_i32 = arith.constant 0 : i32
    %0 = arith.cmpi eq, %arg1, %c0_i32 : i32
    %1 = arith.extui %0 : i1 to i32
    %c0_i32_0 = arith.constant 0 : i32
    %2 = arith.cmpi ne, %1, %c0_i32_0 : i32
    scf.if %2 {
      %c0_76 = arith.constant 0 : index
      %c0_77 = arith.constant 0 : index
      %c0_78 = arith.constant 0 : index
      %191 = vector.load %arg3[%c0_76, %c0_77, %c0_78] : memref<1x8x32xbf16, #tpu.memory_space<vmem>>, vector<1x8x32xbf16>
      %192 = vector.shape_cast %191 : vector<1x8x32xbf16> to vector<8x32xbf16>
      %c0_79 = arith.constant 0 : index
      %c0_80 = arith.constant 0 : index
      %c0_81 = arith.constant 0 : index
      %193 = vector.load %arg4[%c0_79, %c0_80, %c0_81] : memref<1x8x32xbf16, #tpu.memory_space<vmem>>, vector<1x8x32xbf16>
      %194 = vector.shape_cast %193 : vector<1x8x32xbf16> to vector<8x32xbf16>
      %c1 = arith.constant 1 : index
      %c0_82 = arith.constant 0 : index
      %c0_83 = arith.constant 0 : index
      %195 = vector.load %arg5[%c1, %c0_82, %c0_83] : memref<10x32x32xbf16, #tpu.memory_space<vmem>>, vector<1x32x32xbf16>
      %196 = vector.shape_cast %195 : vector<1x32x32xbf16> to vector<32x32xbf16>
      %cst_84 = arith.constant dense<0.000000e+00> : vector<8x32xf32>
      %197 = tpu.matmul %192, %196, %cst_84 {dimension_numbers = #tpu.dot_dimension_numbers<[1], [0], [0], [1], [0, 0, 1, 1], [], []>} : vector<8x32xbf16>, vector<32x32xbf16>, vector<8x32xf32> -> vector<8x32xf32>
      %c1_85 = arith.constant 1 : index
      %c0_86 = arith.constant 0 : index
      %198 = vector.load %arg6[%c1_85, %c0_86] : memref<16x32xf32, #tpu.memory_space<vmem>>, vector<1x32xf32>
      %199 = vector.shape_cast %198 : vector<1x32xf32> to vector<32xf32>
      %200 = vector.shape_cast %199 : vector<32xf32> to vector<1x32xf32>
      %201 = vector.broadcast %200 : vector<1x32xf32> to vector<8x32xf32>
      %202 = arith.addf %197, %201 : vector<8x32xf32>
      %203 = vector.shape_cast %202 : vector<8x32xf32> to vector<8x4x8xf32>
      %204 = tpu.transpose %203, [1, 0, 2] : vector<8x4x8xf32> -> vector<4x8x8xf32>
      %205 = arith.truncf %204 : vector<4x8x8xf32> to vector<4x8x8xbf16>
      %c0_87 = arith.constant 0 : index
      %c0_88 = arith.constant 0 : index
      %c0_89 = arith.constant 0 : index
      %206 = vector.load %arg8[%c0_87, %c0_88, %c0_89] : memref<4x8x8xbf16, #tpu.memory_space<vmem>>, vector<4x8x8xbf16>
      tpu.vector_store %arg8[%c0_87, %c0_88, %c0_89], %205 {strides = array<i32>} : memref<4x8x8xbf16, #tpu.memory_space<vmem>>, vector<4x8x8xbf16>,
      %c2 = arith.constant 2 : index
      %c0_90 = arith.constant 0 : index
      %c0_91 = arith.constant 0 : index
      %207 = vector.load %arg5[%c2, %c0_90, %c0_91] : memref<10x32x32xbf16, #tpu.memory_space<vmem>>, vector<1x32x32xbf16>
      %208 = vector.shape_cast %207 : vector<1x32x32xbf16> to vector<32x32xbf16>
      %cst_92 = arith.constant dense<0.000000e+00> : vector<8x32xf32>
      %209 = tpu.matmul %192, %208, %cst_92 {dimension_numbers = #tpu.dot_dimension_numbers<[1], [0], [0], [1], [0, 0, 1, 1], [], []>} : vector<8x32xbf16>, vector<32x32xbf16>, vector<8x32xf32> -> vector<8x32xf32>
      %c2_93 = arith.constant 2 : index
      %c0_94 = arith.constant 0 : index
      %210 = vector.load %arg6[%c2_93, %c0_94] : memref<16x32xf32, #tpu.memory_space<vmem>>, vector<1x32xf32>
      %211 = vector.shape_cast %210 : vector<1x32xf32> to vector<32xf32>
      %212 = vector.shape_cast %211 : vector<32xf32> to vector<1x32xf32>
      %213 = vector.broadcast %212 : vector<1x32xf32> to vector<8x32xf32>
      %214 = arith.addf %209, %213 : vector<8x32xf32>
      %215 = vector.shape_cast %214 : vector<8x32xf32> to vector<8x4x8xf32>
      %216 = tpu.transpose %215, [1, 0, 2] : vector<8x4x8xf32> -> vector<4x8x8xf32>
      %217 = arith.truncf %216 : vector<4x8x8xf32> to vector<4x8x8xbf16>
      %c0_95 = arith.constant 0 : index
      %c0_96 = arith.constant 0 : index
      %c0_97 = arith.constant 0 : index
      %218 = vector.load %arg9[%c0_95, %c0_96, %c0_97] : memref<4x8x8xbf16, #tpu.memory_space<vmem>>, vector<4x8x8xbf16>
      tpu.vector_store %arg9[%c0_95, %c0_96, %c0_97], %217 {strides = array<i32>} : memref<4x8x8xbf16, #tpu.memory_space<vmem>>, vector<4x8x8xbf16>,
      %c5_98 = arith.constant 5 : index
      %c0_99 = arith.constant 0 : index
      %c0_100 = arith.constant 0 : index
      %219 = vector.load %arg5[%c5_98, %c0_99, %c0_100] : memref<10x32x32xbf16, #tpu.memory_space<vmem>>, vector<1x32x32xbf16>
      %220 = vector.shape_cast %219 : vector<1x32x32xbf16> to vector<32x32xbf16>
      %cst_101 = arith.constant dense<0.000000e+00> : vector<8x32xf32>
      %221 = tpu.matmul %194, %220, %cst_101 {dimension_numbers = #tpu.dot_dimension_numbers<[1], [0], [0], [1], [0, 0, 1, 1], [], []>} : vector<8x32xbf16>, vector<32x32xbf16>, vector<8x32xf32> -> vector<8x32xf32>
      %c7_102 = arith.constant 7 : index
      %c0_103 = arith.constant 0 : index
      %222 = vector.load %arg6[%c7_102, %c0_103] : memref<16x32xf32, #tpu.memory_space<vmem>>, vector<1x32xf32>
      %223 = vector.shape_cast %222 : vector<1x32xf32> to vector<32xf32>
      %224 = vector.shape_cast %223 : vector<32xf32> to vector<1x32xf32>
      %225 = vector.broadcast %224 : vector<1x32xf32> to vector<8x32xf32>
      %226 = arith.addf %221, %225 : vector<8x32xf32>
      %227 = vector.shape_cast %226 : vector<8x32xf32> to vector<8x4x8xf32>
      %228 = tpu.transpose %227, [1, 0, 2] : vector<8x4x8xf32> -> vector<4x8x8xf32>
      %229 = arith.truncf %228 : vector<4x8x8xf32> to vector<4x8x8xbf16>
      %c0_104 = arith.constant 0 : index
      %c0_105 = arith.constant 0 : index
      %c0_106 = arith.constant 0 : index
      %230 = vector.load %arg10[%c0_104, %c0_105, %c0_106] : memref<4x8x8xbf16, #tpu.memory_space<vmem>>, vector<4x8x8xbf16>
      tpu.vector_store %arg10[%c0_104, %c0_105, %c0_106], %229 {strides = array<i32>} : memref<4x8x8xbf16, #tpu.memory_space<vmem>>, vector<4x8x8xbf16>,
      %c6_107 = arith.constant 6 : index
      %c0_108 = arith.constant 0 : index
      %c0_109 = arith.constant 0 : index
      %231 = vector.load %arg5[%c6_107, %c0_108, %c0_109] : memref<10x32x32xbf16, #tpu.memory_space<vmem>>, vector<1x32x32xbf16>
      %232 = vector.shape_cast %231 : vector<1x32x32xbf16> to vector<32x32xbf16>
      %cst_110 = arith.constant dense<0.000000e+00> : vector<8x32xf32>
      %233 = tpu.matmul %194, %232, %cst_110 {dimension_numbers = #tpu.dot_dimension_numbers<[1], [0], [0], [1], [0, 0, 1, 1], [], []>} : vector<8x32xbf16>, vector<32x32xbf16>, vector<8x32xf32> -> vector<8x32xf32>
      %c8_111 = arith.constant 8 : index
      %c0_112 = arith.constant 0 : index
      %234 = vector.load %arg6[%c8_111, %c0_112] : memref<16x32xf32, #tpu.memory_space<vmem>>, vector<1x32xf32>
      %235 = vector.shape_cast %234 : vector<1x32xf32> to vector<32xf32>
      %236 = vector.shape_cast %235 : vector<32xf32> to vector<1x32xf32>
      %237 = vector.broadcast %236 : vector<1x32xf32> to vector<8x32xf32>
      %238 = arith.addf %233, %237 : vector<8x32xf32>
      %239 = vector.shape_cast %238 : vector<8x32xf32> to vector<8x4x8xf32>
      %240 = tpu.transpose %239, [1, 0, 2] : vector<8x4x8xf32> -> vector<4x8x8xf32>
      %241 = arith.truncf %240 : vector<4x8x8xf32> to vector<4x8x8xbf16>
      %c0_113 = arith.constant 0 : index
      %c0_114 = arith.constant 0 : index
      %c0_115 = arith.constant 0 : index
      %242 = vector.load %arg11[%c0_113, %c0_114, %c0_115] : memref<4x8x8xbf16, #tpu.memory_space<vmem>>, vector<4x8x8xbf16>
      tpu.vector_store %arg11[%c0_113, %c0_114, %c0_115], %241 {strides = array<i32>} : memref<4x8x8xbf16, #tpu.memory_space<vmem>>, vector<4x8x8xbf16>,
    } else {
    }
    %c0 = arith.constant 0 : index
    %c0_1 = arith.constant 0 : index
    %c0_2 = arith.constant 0 : index
    %3 = vector.load %arg2[%c0, %c0_1, %c0_2] : memref<1x8x32xf32, #tpu.memory_space<vmem>>, vector<1x8x32xf32>
    %4 = vector.shape_cast %3 : vector<1x8x32xf32> to vector<8x32xf32>
    %5 = arith.truncf %4 : vector<8x32xf32> to vector<8x32xbf16>
    %c0_3 = arith.constant 0 : index
    %c0_4 = arith.constant 0 : index
    %c0_5 = arith.constant 0 : index
    %6 = vector.load %arg5[%c0_3, %c0_4, %c0_5] : memref<10x32x32xbf16, #tpu.memory_space<vmem>>, vector<1x32x32xbf16>
    %7 = vector.shape_cast %6 : vector<1x32x32xbf16> to vector<32x32xbf16>
    %cst = arith.constant dense<0.000000e+00> : vector<8x32xf32>
    %8 = tpu.matmul %5, %7, %cst {dimension_numbers = #tpu.dot_dimension_numbers<[1], [0], [0], [1], [0, 0, 1, 1], [], []>} : vector<8x32xbf16>, vector<32x32xbf16>, vector<8x32xf32> -> vector<8x32xf32>
    %c0_6 = arith.constant 0 : index
    %c0_7 = arith.constant 0 : index
    %9 = vector.load %arg6[%c0_6, %c0_7] : memref<16x32xf32, #tpu.memory_space<vmem>>, vector<1x32xf32>
    %10 = vector.shape_cast %9 : vector<1x32xf32> to vector<32xf32>
    %11 = vector.shape_cast %10 : vector<32xf32> to vector<1x32xf32>
    %12 = vector.broadcast %11 : vector<1x32xf32> to vector<8x32xf32>
    %13 = arith.addf %8, %12 : vector<8x32xf32>
    %c0_8 = arith.constant 0 : index
    %c0_9 = arith.constant 0 : index
    %c0_10 = arith.constant 0 : index
    %14 = vector.load %arg8[%c0_8, %c0_9, %c0_10] : memref<4x8x8xbf16, #tpu.memory_space<vmem>>, vector<4x8x8xbf16>
    %c0_11 = arith.constant 0 : index
    %c0_12 = arith.constant 0 : index
    %c0_13 = arith.constant 0 : index
    %15 = vector.load %arg9[%c0_11, %c0_12, %c0_13] : memref<4x8x8xbf16, #tpu.memory_space<vmem>>, vector<4x8x8xbf16>
    %16 = vector.shape_cast %13 : vector<8x32xf32> to vector<8x4x8xf32>
    %17 = tpu.transpose %16, [1, 0, 2] : vector<8x4x8xf32> -> vector<4x8x8xf32>
    %18 = arith.truncf %17 : vector<4x8x8xf32> to vector<4x8x8xbf16>
    %cst_14 = arith.constant dense<0.000000e+00> : vector<4x8x8xf32>
    %19 = tpu.matmul %18, %14, %cst_14 {dimension_numbers = #tpu.dot_dimension_numbers<[2], [2], [1], [1], [0, 0, 0, 1, 1, 1], [0], [0]>} : vector<4x8x8xbf16>, vector<4x8x8xbf16>, vector<4x8x8xf32> -> vector<4x8x8xf32>
    %cst_15 = arith.constant dense<0xFF800000> : vector<4x8xf32>
    %20 = vector.multi_reduction <maximumf>, %19, %cst_15 [2] : vector<4x8x8xf32> to vector<4x8xf32>
    %21 = vector.shape_cast %20 : vector<4x8xf32> to vector<4x8x1xf32>
    %22 = vector.broadcast %21 : vector<4x8x1xf32> to vector<4x8x8xf32>
    %23 = arith.subf %19, %22 : vector<4x8x8xf32>
    %24 = math.exp %23 : vector<4x8x8xf32>
    %cst_16 = arith.constant dense<0.000000e+00> : vector<4x8xf32>
    %25 = vector.multi_reduction <add>, %24, %cst_16 [2] : vector<4x8x8xf32> to vector<4x8xf32>
    %26 = vector.shape_cast %25 : vector<4x8xf32> to vector<4x8x1xf32>
    %27 = tpu.reciprocal %26 {approx = true} : vector<4x8x1xf32> -> vector<4x8x1xf32>
    %28 = vector.broadcast %27 : vector<4x8x1xf32> to vector<4x8x8xf32>
    %29 = arith.mulf %24, %28 : vector<4x8x8xf32>
    %30 = arith.truncf %29 : vector<4x8x8xf32> to vector<4x8x8xbf16>
    %cst_17 = arith.constant dense<0.000000e+00> : vector<4x8x8xf32>
    %31 = tpu.matmul %30, %15, %cst_17 {dimension_numbers = #tpu.dot_dimension_numbers<[2], [1], [1], [2], [0, 0, 0, 1, 1, 2], [0], [0]>} : vector<4x8x8xbf16>, vector<4x8x8xbf16>, vector<4x8x8xf32> -> vector<4x8x8xf32>
    %32 = tpu.transpose %31, [1, 0, 2] : vector<4x8x8xf32> -> vector<8x4x8xf32>
    %33 = vector.shape_cast %32 : vector<8x4x8xf32> to vector<8x32xf32>
    %34 = arith.truncf %33 : vector<8x32xf32> to vector<8x32xbf16>
    %c3 = arith.constant 3 : index
    %c0_18 = arith.constant 0 : index
    %c0_19 = arith.constant 0 : index
    %35 = vector.load %arg5[%c3, %c0_18, %c0_19] : memref<10x32x32xbf16, #tpu.memory_space<vmem>>, vector<1x32x32xbf16>
    %36 = vector.shape_cast %35 : vector<1x32x32xbf16> to vector<32x32xbf16>
    %cst_20 = arith.constant dense<0.000000e+00> : vector<8x32xf32>
    %37 = tpu.matmul %34, %36, %cst_20 {dimension_numbers = #tpu.dot_dimension_numbers<[1], [0], [0], [1], [0, 0, 1, 1], [], []>} : vector<8x32xbf16>, vector<32x32xbf16>, vector<8x32xf32> -> vector<8x32xf32>
    %c3_21 = arith.constant 3 : index
    %c0_22 = arith.constant 0 : index
    %38 = vector.load %arg6[%c3_21, %c0_22] : memref<16x32xf32, #tpu.memory_space<vmem>>, vector<1x32xf32>
    %39 = vector.shape_cast %38 : vector<1x32xf32> to vector<32xf32>
    %40 = vector.shape_cast %39 : vector<32xf32> to vector<1x32xf32>
    %41 = vector.broadcast %40 : vector<1x32xf32> to vector<8x32xf32>
    %42 = arith.addf %37, %41 : vector<8x32xf32>
    %43 = arith.addf %4, %42 : vector<8x32xf32>
    %c4 = arith.constant 4 : index
    %c0_23 = arith.constant 0 : index
    %44 = vector.load %arg6[%c4, %c0_23] : memref<16x32xf32, #tpu.memory_space<vmem>>, vector<1x32xf32>
    %45 = vector.shape_cast %44 : vector<1x32xf32> to vector<32xf32>
    %c5 = arith.constant 5 : index
    %c0_24 = arith.constant 0 : index
    %46 = vector.load %arg6[%c5, %c0_24] : memref<16x32xf32, #tpu.memory_space<vmem>>, vector<1x32xf32>
    %47 = vector.shape_cast %46 : vector<1x32xf32> to vector<32xf32>
    %cst_25 = arith.constant dense<0.000000e+00> : vector<8xf32>
    %48 = vector.multi_reduction <add>, %43, %cst_25 [1] : vector<8x32xf32> to vector<8xf32>
    %49 = vector.shape_cast %48 : vector<8xf32> to vector<8x1xf32>
    %cst_26 = arith.constant 3.200000e+01 : f32
    %50 = vector.broadcast %cst_26 : f32 to vector<8x1xf32>
    %51 = arith.divf %49, %50 : vector<8x1xf32>
    %52 = vector.broadcast %51 : vector<8x1xf32> to vector<8x32xf32>
    %53 = arith.subf %43, %52 : vector<8x32xf32>
    %54 = arith.mulf %53, %53 : vector<8x32xf32>
    %cst_27 = arith.constant dense<0.000000e+00> : vector<8xf32>
    %55 = vector.multi_reduction <add>, %54, %cst_27 [1] : vector<8x32xf32> to vector<8xf32>
    %56 = vector.shape_cast %55 : vector<8xf32> to vector<8x1xf32>
    %cst_28 = arith.constant 3.200000e+01 : f32
    %57 = vector.broadcast %cst_28 : f32 to vector<8x1xf32>
    %58 = arith.divf %56, %57 : vector<8x1xf32>
    %59 = vector.broadcast %51 : vector<8x1xf32> to vector<8x32xf32>
    %60 = arith.subf %43, %59 : vector<8x32xf32>
    %cst_29 = arith.constant 9.99999974E-6 : f32
    %61 = vector.broadcast %cst_29 : f32 to vector<8x1xf32>
    %62 = arith.addf %58, %61 : vector<8x1xf32>
    %63 = math.rsqrt %62 : vector<8x1xf32>
    %64 = vector.broadcast %63 : vector<8x1xf32> to vector<8x32xf32>
    %65 = arith.mulf %60, %64 : vector<8x32xf32>
    %66 = vector.shape_cast %45 : vector<32xf32> to vector<1x32xf32>
    %67 = vector.broadcast %66 : vector<1x32xf32> to vector<8x32xf32>
    %68 = arith.mulf %65, %67 : vector<8x32xf32>
    %69 = vector.shape_cast %47 : vector<32xf32> to vector<1x32xf32>
    %70 = vector.broadcast %69 : vector<1x32xf32> to vector<8x32xf32>
    %71 = arith.addf %68, %70 : vector<8x32xf32>
    %72 = arith.truncf %71 : vector<8x32xf32> to vector<8x32xbf16>
    %c4_30 = arith.constant 4 : index
    %c0_31 = arith.constant 0 : index
    %c0_32 = arith.constant 0 : index
    %73 = vector.load %arg5[%c4_30, %c0_31, %c0_32] : memref<10x32x32xbf16, #tpu.memory_space<vmem>>, vector<1x32x32xbf16>
    %74 = vector.shape_cast %73 : vector<1x32x32xbf16> to vector<32x32xbf16>
    %cst_33 = arith.constant dense<0.000000e+00> : vector<8x32xf32>
    %75 = tpu.matmul %72, %74, %cst_33 {dimension_numbers = #tpu.dot_dimension_numbers<[1], [0], [0], [1], [0, 0, 1, 1], [], []>} : vector<8x32xbf16>, vector<32x32xbf16>, vector<8x32xf32> -> vector<8x32xf32>
    %c6 = arith.constant 6 : index
    %c0_34 = arith.constant 0 : index
    %76 = vector.load %arg6[%c6, %c0_34] : memref<16x32xf32, #tpu.memory_space<vmem>>, vector<1x32xf32>
    %77 = vector.shape_cast %76 : vector<1x32xf32> to vector<32xf32>
    %78 = vector.shape_cast %77 : vector<32xf32> to vector<1x32xf32>
    %79 = vector.broadcast %78 : vector<1x32xf32> to vector<8x32xf32>
    %80 = arith.addf %75, %79 : vector<8x32xf32>
    %c0_35 = arith.constant 0 : index
    %c0_36 = arith.constant 0 : index
    %c0_37 = arith.constant 0 : index
    %81 = vector.load %arg10[%c0_35, %c0_36, %c0_37] : memref<4x8x8xbf16, #tpu.memory_space<vmem>>, vector<4x8x8xbf16>
    %c0_38 = arith.constant 0 : index
    %c0_39 = arith.constant 0 : index
    %c0_40 = arith.constant 0 : index
    %82 = vector.load %arg11[%c0_38, %c0_39, %c0_40] : memref<4x8x8xbf16, #tpu.memory_space<vmem>>, vector<4x8x8xbf16>
    %83 = vector.shape_cast %80 : vector<8x32xf32> to vector<8x4x8xf32>
    %84 = tpu.transpose %83, [1, 0, 2] : vector<8x4x8xf32> -> vector<4x8x8xf32>
    %85 = arith.truncf %84 : vector<4x8x8xf32> to vector<4x8x8xbf16>
    %cst_41 = arith.constant dense<0.000000e+00> : vector<4x8x8xf32>
    %86 = tpu.matmul %85, %81, %cst_41 {dimension_numbers = #tpu.dot_dimension_numbers<[2], [2], [1], [1], [0, 0, 0, 1, 1, 1], [0], [0]>} : vector<4x8x8xbf16>, vector<4x8x8xbf16>, vector<4x8x8xf32> -> vector<4x8x8xf32>
    %cst_42 = arith.constant dense<0xFF800000> : vector<4x8xf32>
    %87 = vector.multi_reduction <maximumf>, %86, %cst_42 [2] : vector<4x8x8xf32> to vector<4x8xf32>
    %88 = vector.shape_cast %87 : vector<4x8xf32> to vector<4x8x1xf32>
    %89 = vector.broadcast %88 : vector<4x8x1xf32> to vector<4x8x8xf32>
    %90 = arith.subf %86, %89 : vector<4x8x8xf32>
    %91 = math.exp %90 : vector<4x8x8xf32>
    %cst_43 = arith.constant dense<0.000000e+00> : vector<4x8xf32>
    %92 = vector.multi_reduction <add>, %91, %cst_43 [2] : vector<4x8x8xf32> to vector<4x8xf32>
    %93 = vector.shape_cast %92 : vector<4x8xf32> to vector<4x8x1xf32>
    %94 = tpu.reciprocal %93 {approx = true} : vector<4x8x1xf32> -> vector<4x8x1xf32>
    %95 = vector.broadcast %94 : vector<4x8x1xf32> to vector<4x8x8xf32>
    %96 = arith.mulf %91, %95 : vector<4x8x8xf32>
    %97 = arith.truncf %96 : vector<4x8x8xf32> to vector<4x8x8xbf16>
    %cst_44 = arith.constant dense<0.000000e+00> : vector<4x8x8xf32>
    %98 = tpu.matmul %97, %82, %cst_44 {dimension_numbers = #tpu.dot_dimension_numbers<[2], [1], [1], [2], [0, 0, 0, 1, 1, 2], [0], [0]>} : vector<4x8x8xbf16>, vector<4x8x8xbf16>, vector<4x8x8xf32> -> vector<4x8x8xf32>
    %99 = tpu.transpose %98, [1, 0, 2] : vector<4x8x8xf32> -> vector<8x4x8xf32>
    %100 = vector.shape_cast %99 : vector<8x4x8xf32> to vector<8x32xf32>
    %101 = arith.truncf %100 : vector<8x32xf32> to vector<8x32xbf16>
    %c7 = arith.constant 7 : index
    %c0_45 = arith.constant 0 : index
    %c0_46 = arith.constant 0 : index
    %102 = vector.load %arg5[%c7, %c0_45, %c0_46] : memref<10x32x32xbf16, #tpu.memory_space<vmem>>, vector<1x32x32xbf16>
    %103 = vector.shape_cast %102 : vector<1x32x32xbf16> to vector<32x32xbf16>
    %cst_47 = arith.constant dense<0.000000e+00> : vector<8x32xf32>
    %104 = tpu.matmul %101, %103, %cst_47 {dimension_numbers = #tpu.dot_dimension_numbers<[1], [0], [0], [1], [0, 0, 1, 1], [], []>} : vector<8x32xbf16>, vector<32x32xbf16>, vector<8x32xf32> -> vector<8x32xf32>
    %c9 = arith.constant 9 : index
    %c0_48 = arith.constant 0 : index
    %105 = vector.load %arg6[%c9, %c0_48] : memref<16x32xf32, #tpu.memory_space<vmem>>, vector<1x32xf32>
    %106 = vector.shape_cast %105 : vector<1x32xf32> to vector<32xf32>
    %107 = vector.shape_cast %106 : vector<32xf32> to vector<1x32xf32>
    %108 = vector.broadcast %107 : vector<1x32xf32> to vector<8x32xf32>
    %109 = arith.addf %104, %108 : vector<8x32xf32>
    %110 = arith.addf %71, %109 : vector<8x32xf32>
    %c10 = arith.constant 10 : index
    %c0_49 = arith.constant 0 : index
    %111 = vector.load %arg6[%c10, %c0_49] : memref<16x32xf32, #tpu.memory_space<vmem>>, vector<1x32xf32>
    %112 = vector.shape_cast %111 : vector<1x32xf32> to vector<32xf32>
    %c11 = arith.constant 11 : index
    %c0_50 = arith.constant 0 : index
    %113 = vector.load %arg6[%c11, %c0_50] : memref<16x32xf32, #tpu.memory_space<vmem>>, vector<1x32xf32>
    %114 = vector.shape_cast %113 : vector<1x32xf32> to vector<32xf32>
    %cst_51 = arith.constant dense<0.000000e+00> : vector<8xf32>
    %115 = vector.multi_reduction <add>, %110, %cst_51 [1] : vector<8x32xf32> to vector<8xf32>
    %116 = vector.shape_cast %115 : vector<8xf32> to vector<8x1xf32>
    %cst_52 = arith.constant 3.200000e+01 : f32
    %117 = vector.broadcast %cst_52 : f32 to vector<8x1xf32>
    %118 = arith.divf %116, %117 : vector<8x1xf32>
    %119 = vector.broadcast %118 : vector<8x1xf32> to vector<8x32xf32>
    %120 = arith.subf %110, %119 : vector<8x32xf32>
    %121 = arith.mulf %120, %120 : vector<8x32xf32>
    %cst_53 = arith.constant dense<0.000000e+00> : vector<8xf32>
    %122 = vector.multi_reduction <add>, %121, %cst_53 [1] : vector<8x32xf32> to vector<8xf32>
    %123 = vector.shape_cast %122 : vector<8xf32> to vector<8x1xf32>
    %cst_54 = arith.constant 3.200000e+01 : f32
    %124 = vector.broadcast %cst_54 : f32 to vector<8x1xf32>
    %125 = arith.divf %123, %124 : vector<8x1xf32>
    %126 = vector.broadcast %118 : vector<8x1xf32> to vector<8x32xf32>
    %127 = arith.subf %110, %126 : vector<8x32xf32>
    %cst_55 = arith.constant 9.99999974E-6 : f32
    %128 = vector.broadcast %cst_55 : f32 to vector<8x1xf32>
    %129 = arith.addf %125, %128 : vector<8x1xf32>
    %130 = math.rsqrt %129 : vector<8x1xf32>
    %131 = vector.broadcast %130 : vector<8x1xf32> to vector<8x32xf32>
    %132 = arith.mulf %127, %131 : vector<8x32xf32>
    %133 = vector.shape_cast %112 : vector<32xf32> to vector<1x32xf32>
    %134 = vector.broadcast %133 : vector<1x32xf32> to vector<8x32xf32>
    %135 = arith.mulf %132, %134 : vector<8x32xf32>
    %136 = vector.shape_cast %114 : vector<32xf32> to vector<1x32xf32>
    %137 = vector.broadcast %136 : vector<1x32xf32> to vector<8x32xf32>
    %138 = arith.addf %135, %137 : vector<8x32xf32>
    %139 = arith.truncf %138 : vector<8x32xf32> to vector<8x32xbf16>
    %c8 = arith.constant 8 : index
    %c0_56 = arith.constant 0 : index
    %c0_57 = arith.constant 0 : index
    %140 = vector.load %arg5[%c8, %c0_56, %c0_57] : memref<10x32x32xbf16, #tpu.memory_space<vmem>>, vector<1x32x32xbf16>
    %141 = vector.shape_cast %140 : vector<1x32x32xbf16> to vector<32x32xbf16>
    %cst_58 = arith.constant dense<0.000000e+00> : vector<8x32xf32>
    %142 = tpu.matmul %139, %141, %cst_58 {dimension_numbers = #tpu.dot_dimension_numbers<[1], [0], [0], [1], [0, 0, 1, 1], [], []>} : vector<8x32xbf16>, vector<32x32xbf16>, vector<8x32xf32> -> vector<8x32xf32>
    %c12 = arith.constant 12 : index
    %c0_59 = arith.constant 0 : index
    %143 = vector.load %arg6[%c12, %c0_59] : memref<16x32xf32, #tpu.memory_space<vmem>>, vector<1x32xf32>
    %144 = vector.shape_cast %143 : vector<1x32xf32> to vector<32xf32>
    %145 = vector.shape_cast %144 : vector<32xf32> to vector<1x32xf32>
    %146 = vector.broadcast %145 : vector<1x32xf32> to vector<8x32xf32>
    %147 = arith.addf %142, %146 : vector<8x32xf32>
    %cst_60 = arith.constant 0.000000e+00 : f32
    %148 = vector.broadcast %cst_60 : f32 to vector<8x32xf32>
    %149 = arith.maximumf %147, %148 : vector<8x32xf32>
    %150 = arith.truncf %149 : vector<8x32xf32> to vector<8x32xbf16>
    %c9_61 = arith.constant 9 : index
    %c0_62 = arith.constant 0 : index
    %c0_63 = arith.constant 0 : index
    %151 = vector.load %arg5[%c9_61, %c0_62, %c0_63] : memref<10x32x32xbf16, #tpu.memory_space<vmem>>, vector<1x32x32xbf16>
    %152 = vector.shape_cast %151 : vector<1x32x32xbf16> to vector<32x32xbf16>
    %cst_64 = arith.constant dense<0.000000e+00> : vector<8x32xf32>
    %153 = tpu.matmul %150, %152, %cst_64 {dimension_numbers = #tpu.dot_dimension_numbers<[1], [0], [0], [1], [0, 0, 1, 1], [], []>} : vector<8x32xbf16>, vector<32x32xbf16>, vector<8x32xf32> -> vector<8x32xf32>
    %c13 = arith.constant 13 : index
    %c0_65 = arith.constant 0 : index
    %154 = vector.load %arg6[%c13, %c0_65] : memref<16x32xf32, #tpu.memory_space<vmem>>, vector<1x32xf32>
    %155 = vector.shape_cast %154 : vector<1x32xf32> to vector<32xf32>
    %156 = vector.shape_cast %155 : vector<32xf32> to vector<1x32xf32>
    %157 = vector.broadcast %156 : vector<1x32xf32> to vector<8x32xf32>
    %158 = arith.addf %153, %157 : vector<8x32xf32>
    %159 = arith.addf %138, %158 : vector<8x32xf32>
    %c14 = arith.constant 14 : index
    %c0_66 = arith.constant 0 : index
    %160 = vector.load %arg6[%c14, %c0_66] : memref<16x32xf32, #tpu.memory_space<vmem>>, vector<1x32xf32>
    %161 = vector.shape_cast %160 : vector<1x32xf32> to vector<32xf32>
    %c15 = arith.constant 15 : index
    %c0_67 = arith.constant 0 : index
    %162 = vector.load %arg6[%c15, %c0_67] : memref<16x32xf32, #tpu.memory_space<vmem>>, vector<1x32xf32>
    %163 = vector.shape_cast %162 : vector<1x32xf32> to vector<32xf32>
    %cst_68 = arith.constant dense<0.000000e+00> : vector<8xf32>
    %164 = vector.multi_reduction <add>, %159, %cst_68 [1] : vector<8x32xf32> to vector<8xf32>
    %165 = vector.shape_cast %164 : vector<8xf32> to vector<8x1xf32>
    %cst_69 = arith.constant 3.200000e+01 : f32
    %166 = vector.broadcast %cst_69 : f32 to vector<8x1xf32>
    %167 = arith.divf %165, %166 : vector<8x1xf32>
    %168 = vector.broadcast %167 : vector<8x1xf32> to vector<8x32xf32>
    %169 = arith.subf %159, %168 : vector<8x32xf32>
    %170 = arith.mulf %169, %169 : vector<8x32xf32>
    %cst_70 = arith.constant dense<0.000000e+00> : vector<8xf32>
    %171 = vector.multi_reduction <add>, %170, %cst_70 [1] : vector<8x32xf32> to vector<8xf32>
    %172 = vector.shape_cast %171 : vector<8xf32> to vector<8x1xf32>
    %cst_71 = arith.constant 3.200000e+01 : f32
    %173 = vector.broadcast %cst_71 : f32 to vector<8x1xf32>
    %174 = arith.divf %172, %173 : vector<8x1xf32>
    %175 = vector.broadcast %167 : vector<8x1xf32> to vector<8x32xf32>
    %176 = arith.subf %159, %175 : vector<8x32xf32>
    %cst_72 = arith.constant 9.99999974E-6 : f32
    %177 = vector.broadcast %cst_72 : f32 to vector<8x1xf32>
    %178 = arith.addf %174, %177 : vector<8x1xf32>
    %179 = math.rsqrt %178 : vector<8x1xf32>
    %180 = vector.broadcast %179 : vector<8x1xf32> to vector<8x32xf32>
    %181 = arith.mulf %176, %180 : vector<8x32xf32>
    %182 = vector.shape_cast %161 : vector<32xf32> to vector<1x32xf32>
    %183 = vector.broadcast %182 : vector<1x32xf32> to vector<8x32xf32>
    %184 = arith.mulf %181, %183 : vector<8x32xf32>
    %185 = vector.shape_cast %163 : vector<32xf32> to vector<1x32xf32>
    %186 = vector.broadcast %185 : vector<1x32xf32> to vector<8x32xf32>
    %187 = arith.addf %184, %186 : vector<8x32xf32>
    %c0_73 = arith.constant 0 : index
    %c0_74 = arith.constant 0 : index
    %c0_75 = arith.constant 0 : index
    %188 = vector.load %arg7[%c0_73, %c0_74, %c0_75] : memref<1x8x32xf32, #tpu.memory_space<vmem>>, vector<1x8x32xf32>
    %189 = vector.shape_cast %188 : vector<1x8x32xf32> to vector<8x32xf32>
    %190 = vector.shape_cast %187 : vector<8x32xf32> to vector<1x8x32xf32>
    tpu.vector_store %arg7[%c0_73, %c0_74, %c0_75], %190 {strides = array<i32>} : memref<1x8x32xf32, #tpu.memory_space<vmem>>, vector<1x8x32xf32>,
    return
  }
  func.func @transform_0(%arg0: i32, %arg1: i32) -> (i32, i32, i32) {
    %c0_i32 = arith.constant 0 : i32
    %c0_i32_0 = arith.constant 0 : i32
    return %arg0, %arg1, %c0_i32 : i32, i32, i32
  }
  func.func @transform_1(%arg0: i32, %arg1: i32) -> (i32, i32, i32) {
    %c0_i32 = arith.constant 0 : i32
    %c0_i32_0 = arith.constant 0 : i32
    %c0_i32_1 = arith.constant 0 : i32
    return %arg0, %c0_i32, %c0_i32_0 : i32, i32, i32
  }
  func.func @transform_2(%arg0: i32, %arg1: i32) -> (i32, i32, i32) {
    %c0_i32 = arith.constant 0 : i32
    %c0_i32_0 = arith.constant 0 : i32
    %c0_i32_1 = arith.constant 0 : i32
    return %arg0, %c0_i32, %c0_i32_0 : i32, i32, i32
  }
  func.func @transform_3(%arg0: i32, %arg1: i32) -> (i32, i32, i32) {
    %c0_i32 = arith.constant 0 : i32
    %c0_i32_0 = arith.constant 0 : i32
    %c0_i32_1 = arith.constant 0 : i32
    %c0_i32_2 = arith.constant 0 : i32
    return %c0_i32, %c0_i32_0, %c0_i32_1 : i32, i32, i32
  }
  func.func @transform_4(%arg0: i32, %arg1: i32) -> (i32, i32) {
    %c0_i32 = arith.constant 0 : i32
    %c0_i32_0 = arith.constant 0 : i32
    %c0_i32_1 = arith.constant 0 : i32
    return %c0_i32, %c0_i32_0 : i32, i32
  }
  func.func @transform_5(%arg0: i32, %arg1: i32) -> (i32, i32, i32) {
    %c0_i32 = arith.constant 0 : i32
    %c0_i32_0 = arith.constant 0 : i32
    return %arg0, %arg1, %c0_i32 : i32, i32, i32
  }
}

</mosaic_0001>

<bundles_post_ra>
// kernel: tpu_custom_call.1
= control target key start
LH: loop header
LB: loop body
LE: loop exit
PB: predicated region body
PF: predicated region fallthrough
CT: control target
= control target key end

     0   :  { %s4674_s0 = inlined_call_operand.hbm [shape: f32[2,8,32], index: 0, kind: input, shape index: {}]   ;;  %s4675_s1 = inlined_call_operand.hbm [shape: bf16[2,8,32], index: 1, kind: input, shape index: {}]   ;;  %s4676_s2 = inlined_call_operand.hbm [shape: bf16[2,8,32], index: 2, kind: input, shape index: {}]   ;;  %s4677_s3 = inlined_call_operand.hbm [shape: bf16[10,32,32], index: 3, kind: input, shape index: {}]   ;;  %s4678_s4 = inlined_call_operand.hbm [shape: f32[16,32], index: 4, kind: input, shape index: {}]   ;;  %s4679_s5 = inlined_call_operand.hbm [shape: f32[2,8,32], index: 5, kind: output, shape index: {}]  }
   0x1   :  { %4691 = sst [smem:[#allocation22_spill]] %s4675_s1 }
   0x2   :  { %4692 = sst [smem:[#allocation23_spill]] %s4679_s5 }
   0x3   :  { %10 = vsyncpa [#allocation7], 0 }
   0x4   :  { %12 = vsyncpa [#allocation7 + $0x1], 0 }
   0x5   :  { %13 = vsyncpa [#allocation10], 0 }
   0x6   :  { %14 = vsyncpa [#allocation13], 0 }
   0x7   :  { %15 = vsyncpa [#allocation8], 0 }
   0x8   :  { %17 = vsyncpa [#allocation8 + $0x1], 0  ;;  %s4051_s18 = smov 0   ;;  %s4053_s19 = smov 0  }
   0x9   :  { %s4055_s20 = smov 0   ;;  %s4057_s21 = smov 0  }
   0xa   :  { %s4059_s22 = smov 0   ;;  %s4061_s23 = smov 0  }
   0xb LB: > { %4693 = sst [smem:[#allocation20_spill]] %s3979_s18  ;;  %s3273_s24 = sadd.s32 4294967295, %s3999_s23   ;;  %s3999_s23 = sphi %s4061_s23, %s23_s23   ;;  %s3995_s22 = sphi %s4059_s22, %s4722_s22   ;;  %s3991_s21 = sphi %s4057_s21, %s4721_s21   ;;  %s3987_s20 = sphi %s4055_s20, %s4720_s20   ;;  %s3983_s19 = sphi %s4053_s19, %s4719_s19   ;;  %s3979_s18 = sphi %s4051_s18, %s4718_s18  }
   0xc   : > { %s3274_s25 = sadd.s32 4294967294, %s3999_s23   ;;  %p57_p0 = scmp.ne.s32.totalorder %s3983_s19, %s3979_s18 }
   0xd   : > { %p4085_p1 = scmp.eq.s32.totalorder %s3273_s24, 0  ;;  %p4089_p2 = scmp.eq.s32.totalorder %s3273_s24, 1 }
   0xe   : > { %p183_p3 = scmp.eq.s32.totalorder %s3274_s25, 1  ;;  %p3275_p5 = scmp.ge.s32.totalorder %s3999_s23, 1 }
   0xf   : > { %s4694_s26 = scalar_select %p4085_p1, 1, 0 }
  0x10   : > { %s4695_s27 = scalar_select %p4089_p2, 1, 0 }
  0x11   : > { %p4095_p4 = por %p4085_p1, %p57_p0  ;;  %p4100_p6 = por %p183_p3, %p57_p0 }
  0x12   : > { %p190_p7 = scmp.lt.s32.totalorder %s3999_s23, 3  ;;  %s3276_s30 = sshll.u32 %s3991_s21, 6 }
  0x13   : > { %s4696_s28 = scalar_select %p4095_p4, 1, 0 }
  0x14   : > { %s4697_s29 = scalar_select %p4100_p6, 1, 0 }
  0x15   : > { %p4106_p8 = pnand %p3275_p5, %p190_p7  ;;  %s4700_s1 = sld [smem:[#allocation22_spill]] }
  0x16   : > { %4698 = sst [smem:[#allocation21_spill]] %s4697_s29  ;;  %s4001_s10 = smov [#allocation9]  }
  0x17   : > { %s4699_s6 = scalar_select %p4106_p8, 1, 0 }
  0x18   : > { %s205_s11 = sshll.u32 %s4001_s10, 4  ;;  %p3624_p9 = pneg %p4106_p8  ;;  %s206_s11 = int_to_ptr.vmem [resolvable:$true] %s205_s11 }
  0x19   : > { %s4002_s13 = smov [#allocation12]  }
  0x1a   : > { %p4122_p11 = pnand %p3624_p9, %p4095_p4  ;;  %s228_s14 = sshll.u32 %s4002_s13, 4  ;;  %s4126_s14 = int_to_ptr.vmem [resolvable:$true] %s228_s14 }
  0x1b   : > { %s4115_s9 = scalar_lea.hbm %s4700_s1, %s3276_s30  ;;  %p4130_p12 = pnand %p3624_p9, %p4085_p1 }
  0x1c   : > { %s3775_s16 = scalar_lea.hbm %s4115_s9, 64  ;;  %p3777_p0 = pneg %p4122_p11 }
  0x1d   : > { %s4702_s15 = scalar_select %p4130_p12, 1, 0 }
  0x1e   : > { %p3776_p13 = scmp.ne.s32.totalorder %s4115_s9, %s3775_s16  ;;  %s3780_s25 = scalar_lea.hbm %s4700_s1, 128 }
  0x1f   : > { %p3781_p7 = scmp.lt.s32.totalorder %s4115_s9, %s4700_s1  ;;  %p3782_p9 = scmp.lt.s32.totalorder %s3780_s25, %s3775_s16 }
  0x20   : > { %p3778_p3 = pnand %p3777_p0, %p3776_p13 }
  0x21   : > { %p3783_p10 = por %p3782_p9, %p3781_p7 }
  0x22   : > { %p3779_p5 = pneg %p3778_p3 }
  0x24   : > { %p3784_p6 = pnand %p3783_p10, %p3779_p5 }
  0x26   : > { %3787 = shalt.err (!%p3784_p6)
}
  0x27   : > { %s3788_s10 = scalar_lea.vmem %s206_s11, 64  ;;  %p3796_p3 = scmp.lt.s32.totalorder %s206_s11, %s206_s11 }
  0x28   : > { %p3789_p1 = scmp.ne.s32.totalorder %s206_s11, %s3788_s10  ;;  %p3797_p8 = scmp.lt.s32.totalorder %s3788_s10, %s3788_s10 }
  0x2a   : > { %p3791_p4 = pnand %p3789_p1, %p3777_p0  ;;  %p3798_p2 = por %p3797_p8, %p3796_p3 }
  0x2c   : > { %p3792_p13 = pneg %p3791_p4 }
  0x2e   : > { %p3799_p12 = pnand %p3798_p2, %p3792_p13 }
  0x30   : > { %3802 = shalt.err (!%p3799_p12)
}
  0x31   : > { %3627 = dma.hbm_to_vmem [thread:$0]  (!%p4122_p11), %s4115_s9, 64, %s206_s11, [#allocation10]  }
  0x32   : > { %p4703_p6 = scmp.ne.s32.totalorder %s4702_s15, 0  ;;  %s3814_s13 = scalar_lea.vmem %s4126_s14, 2560 }
  0x33   : > { %p3815_p5 = scmp.ne.s32.totalorder %s4126_s14, %s3814_s13  ;;  %p3822_p2 = scmp.lt.s32.totalorder %s4126_s14, %s4126_s14 }
  0x34   : > { %p4689_p10 = pneg %p4703_p6  ;;  %p3823_p8 = scmp.lt.s32.totalorder %s3814_s13, %s3814_s13 }
  0x36   : > { %p3817_p1 = pnand %p3815_p5, %p4689_p10  ;;  %p3824_p12 = por %p3823_p8, %p3822_p2 }
  0x38   : > { %p3818_p4 = pneg %p3817_p1 }
  0x3a   : > { %p3825_p7 = pnand %p3824_p12, %p3818_p4 }
  0x3c   : > { %3828 = shalt.err (!%p3825_p7)
}
  0x3d   : > { %s4003_s16 = smov 64   ;;  %s4004_s9 = smov 4  }
  0x3e   : > { %3633 = dma.hbm_to_vmem [thread:$0]  (!%p4703_p6), %s4677_s3, 2560, %s4126_s14, [#allocation13], %s4003_s16, %s4003_s16, %s4004_s9  }
  0x3f   : > { %s216_s7 = scalar_lea.hbm %s4676_s2, %s3276_s30  ;;  %s4005_s8 = smov [#allocation11]  }
  0x40   : > { %s218_s10 = sshll.u32 %s4005_s8, 4  ;;  %s4006_s13 = smov [#allocation14]   ;;  %s219_s10 = int_to_ptr.vmem [resolvable:$true] %s218_s10 }
  0x41   : > { %s241_s1 = sshll.u32 %s4006_s13, 4  ;;  %s3829_s29 = scalar_lea.hbm %s216_s7, 64  ;;  %s242_s1 = int_to_ptr.vmem [resolvable:$true] %s241_s1 }
  0x42   : > { %p3830_p9 = scmp.ne.s32.totalorder %s216_s7, %s3829_s29  ;;  %s3834_s14 = scalar_lea.hbm %s4676_s2, 128 }
  0x43   : > { %p3835_p5 = scmp.lt.s32.totalorder %s216_s7, %s4676_s2  ;;  %p3836_p1 = scmp.lt.s32.totalorder %s3834_s14, %s3829_s29 }
  0x44   : > { %p3832_p13 = pnand %p3830_p9, %p3777_p0 }
  0x45   : > { %p3837_p4 = por %p3836_p1, %p3835_p5 }
  0x46   : > { %p3833_p3 = pneg %p3832_p13 }
  0x48   : > { %p3838_p2 = pnand %p3837_p4, %p3833_p3 }
  0x4a   : > { %3841 = shalt.err (!%p3838_p2)
}
  0x4b   : > { %s3842_s30 = scalar_lea.vmem %s219_s10, 64  ;;  %p3850_p9 = scmp.lt.s32.totalorder %s219_s10, %s219_s10 }
  0x4c   : > { %p3843_p8 = scmp.ne.s32.totalorder %s219_s10, %s3842_s30  ;;  %p3851_p13 = scmp.lt.s32.totalorder %s3842_s30, %s3842_s30 }
  0x4e   : > { %p3845_p12 = pnand %p3843_p8, %p3777_p0  ;;  %p3852_p10 = por %p3851_p13, %p3850_p9 }
  0x50   : > { %p3846_p7 = pneg %p3845_p12 }
  0x52   : > { %p3853_p6 = pnand %p3852_p10, %p3846_p7 }
  0x54   : > { %3856 = shalt.err (!%p3853_p6)
}
  0x55   : > { %3630 = dma.hbm_to_vmem [thread:$0]  (!%p4122_p11), %s216_s7, 64, %s219_s10, [#allocation10]  }
  0x56   : > { %s3868_s5 = scalar_lea.vmem %s242_s1, 256  ;;  %p4704_p5 = scmp.ne.s32.totalorder %s4702_s15, 0 }
  0x57   : > { %p3869_p3 = scmp.ne.s32.totalorder %s242_s1, %s3868_s5  ;;  %p3876_p0 = scmp.lt.s32.totalorder %s242_s1, %s242_s1 }
  0x58   : > { %p4705_p1 = pneg %p4704_p5  ;;  %p3877_p8 = scmp.lt.s32.totalorder %s3868_s5, %s3868_s5 }
  0x5a   : > { %p3871_p4 = pnand %p3869_p3, %p4705_p1  ;;  %p3878_p12 = por %p3877_p8, %p3876_p0 }
  0x5c   : > { %p3872_p2 = pneg %p3871_p4 }
  0x5e   : > { %p3879_p9 = pnand %p3878_p12, %p3872_p2 }
  0x60   : > { %3882 = shalt.err (!%p3879_p9)
}
  0x61   : > { %s4007_s18 = smov 128   ;;  %s4008_s29 = smov 8  }
  0x62   : > { %3636 = dma.hbm_to_vmem [thread:$0]  (!%p4704_p5), %s4678_s4, 256, %s242_s1, [#allocation13], %s4007_s18, %s4007_s18, %s4008_s29  }
  0x63   : > { %s44_s17 = sadd.s32 1, %s3987_s20  ;;  %s35_s24 = sadd.s32 1, %s3995_s22 }
  0x64   : > { %p51_p11 = scmp.ne.s32.totalorder %s3987_s20, %s3983_s19  ;;  %p37_p6 = scmp.ge.s32.totalorder %s35_s24, 2 }
  0x65   : > { %p52_p10 = scmp.eq.s32.totalorder %s3999_s23, 0  ;;  %p4706_p7 = scmp.ne.s32.totalorder %s4695_s27, 0 }
  0x66   : > { %p3647_p3 = scmp.lt.s32.totalorder %s3999_s23, 2  ;;  %s4724_s24 = smov (%p37_p6, %s35_s24), 0 }
  0x67   : > { %p4203_p13 = por %p4706_p7, %p51_p11  ;;  %p53_p1 = por %p52_p10, %p51_p11 }
  0x68   : > { %s255_s15 = sand.u32 1, %s3987_s20   ;;  %s39_s7 = ssub.s32 %s3995_s22, %s4724_s24 }
  0x69   : > { %p42_p4 = scmp.eq.s32.totalorder %s39_s7, 0  ;;  %s3281_s1 = sshll.u32 %s255_s15, 3 }
  0x6a   : > { %s3282_s8 = sshll.u32 %s3995_s22, 7  ;;  %s259_s16 = scalar_lea.vmem [#allocation6], %s3281_s1 }
  0x6b   : > { %s4215_s10 = scalar_select %p42_p4, %s3987_s20, %s44_s17  }
  0x6c   : > { %s265_s27 = scalar_lea.hbm %s4674_s0, %s3282_s8  ;;  %s267_s9 = sshll.u32 %s259_s16, 4  ;;  %s268_s9 = int_to_ptr.vmem [resolvable:$true] %s267_s9 }
  0x6d   : > { %p4222_p5 = pnand %p3647_p3, %p53_p1  ;;  %s256_s5 = scalar_lea.sflag [#allocation7], %s255_s15 }
  0x6e   : > { %s3896_s18 = scalar_lea.vmem %s268_s9, 128  ;;  %s4009_s29 = smov [#allocation6]  }
  0x6f   : > { %p3885_p2 = pneg %p4222_p5  ;;  %p3897_p0 = scmp.ne.s32.totalorder %s268_s9, %s3896_s18 }
  0x70   : > { %s3901_s12 = sshll.u32 %s4009_s29, 4  ;;  %s3902_s12 = int_to_ptr.vmem [resolvable:$false] %s3901_s12 }
  0x71   : > { %p3899_p8 = pnand %p3897_p0, %p3885_p2  ;;  %s3903_s11 = scalar_lea.vmem %s3902_s12, 256 }
  0x72   : > { %p3904_p9 = scmp.lt.s32.totalorder %s268_s9, %s3902_s12  ;;  %p3905_p11 = scmp.lt.s32.totalorder %s3903_s11, %s3896_s18 }
  0x73   : > { %p3900_p12 = pneg %p3899_p8 }
  0x74   : > { %p3906_p6 = por %p3905_p11, %p3904_p9 }
  0x76   : > { %p3907_p10 = pnand %p3906_p6, %p3900_p12 }
  0x78   : > { %3910 = shalt.err (!%p3907_p10)
}
  0x79   : > { %3640 = dma.hbm_to_vmem [thread:$0]  (!%p4222_p5), %s265_s27, 128, %s268_s9, %s256_s5  }
  0x7a   : > { %p4709_p7 = scmp.ne.s32.totalorder %s4699_s6, 0 }
  0x7b   : > { %s4233_s17 = sand.u32 (!%p4709_p7), 1, %s3983_s19   ;;  %p4710_p3 = scmp.ne.s32.totalorder (!%p4709_p7), %s4696_s28, 0 }
  0x7c   : > { %276 = sbr.rel (%p4709_p7) target bundleno = 4268 (0x10ac), region = 40  ;;  %s3284_s15 = sshll.u32 (!%p4709_p7), %s4233_s17, 3 }
  0x7d   : > { %s279_s7 = scalar_lea.sflag (!%p4709_p7), [#allocation7], %s4233_s17  ;;  %s4239_s1 = scalar_lea.vmem (!%p4709_p7), [#allocation6], %s3284_s15 }
  0x81   : > { %3962 = dma.done.wait (%p4710_p3), %s279_s7, 128  }
  0x82   : > { %3964 = vsyncadd (%p4710_p3), %s279_s7, 4294967168 }
  0x83   : > { %3966 = dma.done.wait (%p4710_p3), [#allocation10], 128  }
  0x84   : > { %3968 = vsyncadd (%p4710_p3), [#allocation10], 4294967168  ;;  %p4711_p1 = scmp.ne.s32.totalorder %s4694_s26, 0 }
  0x86   : > { %3970 = dma.done.wait (%p4711_p1), [#allocation13], 2816  }
  0x87   : > { %3972 = vsyncadd (%p4711_p1), [#allocation13], 4294964480  ;;  %v4010_v0 = vmov 0.0   ;;  %vm4011_vm0 = vmmov 0   ;;  %v3717_v1 = vld [vmem:[#allocation12 + $0x18] sm:$0xff]   ;;  %v3718_v2 = vld [vmem:[#allocation12 + $0x10] sm:$0xff]   ;;  %v413_v33 = vlaneseq }
  0x88   : > { %3432 = vmatprep.subr.bf16.mxu0 %v4010_v0  ;;  %3436 = vmatprep.mubr.msk.bf16.mxu0 %vm4011_vm0, %v4010_v0  ;;  %v330_v3 = vld [vmem:[#allocation9] sm:$0xf]  ;;  %vm354_vm1 = vcmask 261120   ;;  %v3720_v5 = vld [vmem:[#allocation12 + $0x50] sm:$0xff]   ;;  %v331_v6 = vld [vmem:[#allocation11] sm:$0xf] }
  0x89   : > { %3440 = vmatprep.subr.bf16.mxu1 %v4010_v0  ;;  %3444 = vmatprep.mubr.msk.bf16.mxu1 %vm4011_vm0, %v4010_v0  ;;  %v3719_v4 = vld [vmem:[#allocation12 + $0x58] sm:$0xff]   ;;  %v3721_v7 = vld [vmem:[#allocation12 + $0x8] sm:$0xff]   ;;  %v3722_v8 = vld [vmem:[#allocation12] sm:$0xff]   ;;  %s4012_s26 = smov 104   ;;  %s4013_s28 = smov 120   ;;  %v414_v37 = vshrl.u32 %v413_v33, 7 }
  0x8a   : > { %3433 = vmatpush3.bf16.msra.mxu0 %v3717_v1  ;;  %v4270_v9 = vld [vmem:[%s4239_s1] sm:$0xff]  ;;  %v3288_v11 = vld [vmem:[#allocation14 + $0x1] ss:$0 sm:$0xff]  ;;  %s4014_s6 = smov 112   ;;  %v3312_v25 = vld [vmem:[#allocation14] ss:$0 sm:$0xff] }
  0x8b   : > { %3434 = vmatprep.subr.bf16.mxu0 %v4010_v0  ;;  %v1205_v10 = vpack.c.bf16 %v4270_v9, %v4270_v9  ;;  %v3723_v12 = vld [vmem:[#allocation12 + $0x28] sm:$0xff]   ;;  %v3724_v17 = vld [vmem:[#allocation12 + $0x20] sm:$0xff]   ;;  %v4015_v31 = vmov 1983009808   ;;  %v4016_v34 = vmov 1934713408  }
  0x8c   : > { %3441 = vmatpush3.bf16.msra.mxu1 %v3723_v12  ;;  %v3725_v20 = vld [vmem:[#allocation12 + $0x68] sm:$0xff]   ;;  %v3726_v23 = vld [vmem:[#allocation12 + $0x60] sm:$0xff]   ;;  %v411_v32 = vunpack.c.l.s4 %v4015_v31  ;;  %v443_v35 = vunpack.c.l.s4 %v4016_v34  ;;  %vm548_vm2 = vcmask 60416   ;;  %vm1429_vm3 = vcmask 64512   ;;  %s4017_s8 = smov 16   ;;  %s4018_s13 = smov 8  }
  0x8d   : > { %3442 = vmatprep.subr.bf16.mxu1 %v4010_v0  ;;  %vm1665_vm4 = vcmask 1043456   ;;  %s4019_s14 = smov 24   ;;  %vm1996_vm5 = vcmask 130048   ;;  %vm1998_vm6 = vcmask 195584   ;;  %s3367_s27 = sshll.u32 %s3991_s21, 7 }
  0x8e   : > { %3435 = vmatpush3.bf16.msra.mxu0 %v3718_v2  ;;  %v412_v36 = vunpack.c.0.s8 %v411_v32  ;;  %v444_v40 = vunpack.c.0.s8 %v443_v35  ;;  %s324_s16 = scalar_lea.vmem [#allocation15], %s3284_s15  ;;  %s4712_s18 = sld [smem:[#allocation23_spill]] }
  0x8f   : > { %3448 = vmatprep.subr.bf16.mxu0 %v4010_v0  ;;  %s3151_s9 = sshll.u32 %s324_s16, 4  ;;  %s3137_s11 = scalar_lea.sflag [#allocation8], %s4233_s17  ;;  %s3152_s9 = int_to_ptr.vmem [resolvable:$true] %s3151_s9 }
  0x90   : > { %3443 = vmatpush3.bf16.msra.mxu1 %v3724_v17  ;;  %v4302_v41 = vsub.s32 %v412_v36, %v414_v37  ;;  %v4304_v47 = vsub.s32 %v444_v40, %v414_v37  ;;  %s3911_s7 = scalar_lea.vmem %s3152_s9, 128  ;;  %s4020_s1 = smov [#allocation15]  }
  0x91   : > { %3437 = vmatmul.mubr.msk.bf16.vlgmr.msra.gmra.mxu0 %vm354_vm1, %v330_v3  ;;  %3456 = vmatprep.subr.bf16.mxu1 %v4010_v0  ;;  %p3912_p4 = scmp.ne.s32.totalorder %s3152_s9, %s3911_s7  ;;  %s3915_s21 = sshll.u32 %s4020_s1, 4  ;;  %s3916_s21 = int_to_ptr.vmem [resolvable:$false] %s3915_s21 }
  0x92   : > { %3449 = vmatpush3.bf16.msra.mxu0 %v3719_v4  ;;  %3452 = vmatprep.mubr.msk.bf16.mxu0 %vm4011_vm0, %v4010_v0  ;;  %s3917_s15 = scalar_lea.vmem %s3916_s21, 256  ;;  %p3918_p0 = scmp.lt.s32.totalorder %s3152_s9, %s3916_s21 }
  0x93   : > { %3450 = vmatprep.subr.bf16.mxu0 %v4010_v0  ;;  %3445 = vmatmul.mubr.msk.bf16.vlgmr.msra.gmra.mxu1 %vm354_vm1, %v330_v3  ;;  %p3913_p5 = pnand %p3912_p4, %p4203_p13  ;;  %p3919_p8 = scmp.lt.s32.totalorder %s3917_s15, %s3911_s7 }
  0x94   : > { %3457 = vmatpush3.bf16.msra.mxu1 %v3725_v20  ;;  %3460 = vmatprep.mubr.msk.bf16.mxu1 %vm4011_vm0, %v4010_v0  ;;  %s4713_s29 = smov %s4712_s18  ;;  %s3149_s12 = scalar_lea.hbm %s4712_s18, %s3367_s27 }
  0x95   : > { %3458 = vmatprep.subr.bf16.mxu1 %v4010_v0  ;;  %p3914_p2 = pneg %p3913_p5  ;;  %p3920_p12 = por %p3919_p8, %p3918_p0 }
  0x96   : > { %3451 = vmatpush3.bf16.msra.mxu0 %v3720_v5 }
  0x97   : > { %3464 = vmatprep.subr.bf16.mxu0 %v4010_v0  ;;  %p3921_p9 = pnand %p3920_p12, %p3914_p2 }
  0x98   : > { %3459 = vmatpush3.bf16.msra.mxu1 %v3726_v23 }
  0x99   : > { %3453 = vmatmul.mubr.msk.bf16.vlgmr.msra.gmra.mxu0 %vm354_vm1, %v331_v6  ;;  %3472 = vmatprep.subr.bf16.mxu1 %v4010_v0 }
  0x9a   : > { %3465 = vmatpush3.bf16.msra.mxu0 %v3721_v7  ;;  %3468 = vmatprep.mubr.msk.bf16.mxu0 %vm4011_vm0, %v4010_v0 }
  0x9b   : > { %3466 = vmatprep.subr.bf16.mxu0 %v4010_v0  ;;  %3461 = vmatmul.mubr.msk.bf16.vlgmr.msra.gmra.mxu1 %vm354_vm1, %v331_v6 }
  0x9c   : > { %3474 = vmatprep.mubr.msk.bf16.mxu1 %vm4011_vm0, %v4010_v0 }
  0x9e   : > { %3467 = vmatpush3.bf16.msra.mxu0 %v3722_v8 }
  0x9f   : > { %3478 = vmatprep.subr.bf16.mxu0 %v4010_v0 }
  0xa1   : > { %3469 = vmatmul.mubr.msk.bf16.vlgmr.msra.gmra.mxu0 %vm354_vm1, %v1205_v10 }
  0xa2   : > { %3480 = vmatprep.mubr.msk.bf16.mxu0 %vm4011_vm0, %v4010_v0 }
 0x151   : > { %v392_v13 = vpop.f32.mrf.mxu0 }
 0x152   : > { %v393_v14 = vadd.f32 %v3288_v11, %v392_v13 }
 0x153   : > { %v3438_v15 = vpop.f32.mrf.mxu0 }
 0x154   : > { %405 = vrot.lane.b32.xlu1 %v393_v14, %s4012_s26  ;;  %399 = vrot.lane.b32.xlu0 %v393_v14, %s4013_s28 }
 0x155   : > { %v395_v16 = vpop.f32.mrf.mxu0 }
 0x157   : > { %v3439_v18 = vpop.f32.mrf.mxu0 }
 0x158   : > { %402 = vrot.lane.b32.xlu0 %v393_v14, %s4014_s6 }
 0x159   : > { %v4284_v19 = vpop.f32.mrf.mxu0 }
 0x15b   : > { %v3454_v21 = vpop.f32.mrf.mxu0 }
 0x15d   : > { %v831_v22 = vpop.f32.mrf.mxu0 }
 0x15f   : > { %v3455_v24 = vpop.f32.mrf.mxu0 }
 0x161   : > { %v1265_v26 = vpop.f32.mrf.mxu0 }
 0x162   : > { %v4291_v27 = vadd.f32 %v3312_v25, %v1265_v26 }
 0x163   : > { %v3470_v28 = vpop.f32.mrf.mxu0 }
 0x164   : > { %1283 = vrot.lane.b32.xlu0 %v4291_v27, %s4014_s6  ;;  %1280 = vrot.lane.b32.xlu1 %v4291_v27, %s4013_s28 }
 0x165   : > { %v1268_v29 = vpop.f32.mrf.mxu0 }
 0x167   : > { %v3471_v30 = vpop.f32.mrf.mxu0 }
 0x168   : > { %1286 = vrot.lane.b32.xlu1 %v4291_v27, %s4012_s26 }
 0x1c6   : > { %v406_v38 = vpop.permute.xlu1 %405  ;;  %v400_v39 = vpop.permute.xlu0 %399 }
 0x1c7   : > { %v424_v42 = vcombine.low %v400_v39, %v406_v38  ;;  %v425_v43 = vcombine.high %v400_v39, %v406_v38 }
 0x1c9   : > { %v432_v48 = vrot.slane %v424_v42, %v4302_v41  ;;  %v439_v49 = vrot.slane %v425_v43, %v4302_v41 }
 0x1ca   : > { %v403_v44 = vpop.permute.xlu0 %402 }
 0x1cb   : > { %v408_v45 = vcombine.low %v393_v14, %v403_v44  ;;  %v409_v46 = vcombine.high %v393_v14, %v403_v44 }
 0x1cd   : > { %v416_v50 = vrot.slane %v408_v45, %v4302_v41  ;;  %v423_v51 = vrot.slane %v409_v46, %v4302_v41 }
 0x1cf   : > { %v440_v52 = vcombine.low %v416_v50, %v432_v48  ;;  %v441_v53 = vcombine.high %v416_v50, %v432_v48  ;;  %v456_v54 = vcombine.low %v423_v51, %v439_v49  ;;  %v457_v55 = vcombine.high %v423_v51, %v439_v49 }
 0x1d1   : > { %v448_v56 = vrot.slane %v440_v52, %v4304_v47  ;;  %v455_v57 = vrot.slane %v441_v53, %v4304_v47  ;;  %v464_v58 = vrot.slane %v456_v54, %v4304_v47  ;;  %v471_v59 = vrot.slane %v457_v55, %v4304_v47 }
 0x1d3   : > { %v476_v60 = vcombine.low %v448_v56, %v455_v57  ;;  %v3292_v61 = vcombine.high %v448_v56, %v455_v57  ;;  %v492_v62 = vcombine.low %v464_v58, %v471_v59  ;;  %v3293_v63 = vcombine.high %v464_v58, %v471_v59 }
 0x1d5   : > { %v483_v1 = vrot.slane %v476_v60, %v4302_v41  ;;  %v491_v2 = vrot.slane %v3292_v61, %v4302_v41  ;;  %v499_v3 = vrot.slane %v492_v62, %v4302_v41  ;;  %v507_v4 = vrot.slane %v3293_v63, %v4302_v41 }
 0x1d6   : > { %v1281_v5 = vpop.permute.xlu1 %1280  ;;  %v1284_v11 = vpop.permute.xlu0 %1283 }
 0x1d7   : > { %v508_v6 = vcombine.low %v483_v1, %v491_v2  ;;  %v509_v7 = vcombine.high %v483_v1, %v491_v2  ;;  %v524_v8 = vcombine.low %v499_v3, %v507_v4  ;;  %v525_v10 = vcombine.high %v499_v3, %v507_v4 }
 0x1d8   : > { %v1289_v16 = vcombine.low %v4291_v27, %v1284_v11  ;;  %v1290_v17 = vcombine.high %v4291_v27, %v1284_v11 }
 0x1d9   : > { %v516_v12 = vrot.slane %v508_v6, %v4304_v47  ;;  %v523_v13 = vrot.slane %v509_v7, %v4304_v47  ;;  %v532_v14 = vrot.slane %v524_v8, %v4304_v47  ;;  %v539_v15 = vrot.slane %v525_v10, %v4304_v47 }
 0x1da   : > { %v1287_v18 = vpop.permute.xlu1 %1286  ;;  %v1297_v31 = vrot.slane %v1289_v16, %v4302_v41  ;;  %v1304_v32 = vrot.slane %v1290_v17, %v4302_v41 }
 0x1db   : > { %v540_v20 = vcombine.low %v516_v12, %v532_v14  ;;  %v541_v21 = vcombine.high %v516_v12, %v532_v14  ;;  %v542_v22 = vcombine.low %v523_v13, %v539_v15  ;;  %v543_v23 = vcombine.high %v523_v13, %v539_v15  ;;  %v609_v14 = vpop.f32.mrf.mxu1 }
 0x1dc   : > { %v1305_v24 = vcombine.low %v1281_v5, %v1287_v18  ;;  %v1306_v25 = vcombine.high %v1281_v5, %v1287_v18 }
 0x1dd   : > { %v544_v26 = vpack.c.bf16 %v540_v20, %v540_v20  ;;  %v545_v28 = vpack.c.bf16 %v541_v21, %v541_v21  ;;  %v546_v29 = vpack.c.bf16 %v542_v22, %v542_v22  ;;  %v547_v30 = vpack.c.bf16 %v543_v23, %v543_v23  ;;  %v3446_v15 = vpop.f32.mrf.mxu1 }
 0x1de   : > { %v1313_v33 = vrot.slane %v1305_v24, %v4302_v41  ;;  %v1320_v27 = vrot.slane %v1306_v25, %v4302_v41 }
 0x1df   : > { %549 = vst.msk [vmem:[#allocation2] sm:$0xf] %vm548_vm2, %v544_v26  ;;  %550 = vst.msk [vmem:[#allocation2 + $0x4] sm:$0xf] %vm548_vm2, %v545_v28  ;;  %v612_v16 = vpop.f32.mrf.mxu1 }
 0x1e0   : > { %551 = vst.msk [vmem:[#allocation2 + $0x8] sm:$0xf] %vm548_vm2, %v546_v29  ;;  %552 = vst.msk [vmem:[#allocation2 + $0xc] sm:$0xf] %vm548_vm2, %v547_v30  ;;  %v1321_v34 = vcombine.low %v1297_v31, %v1313_v33  ;;  %v1322_v35 = vcombine.high %v1297_v31, %v1313_v33  ;;  %v1337_v36 = vcombine.low %v1304_v32, %v1320_v27 }
 0x1e1   : > { %v1338_v37 = vcombine.high %v1304_v32, %v1320_v27  ;;  %v3447_v17 = vpop.f32.mrf.mxu1 }
 0x1e2   : > { %v1329_v38 = vrot.slane %v1321_v34, %v4304_v47  ;;  %v1336_v39 = vrot.slane %v1322_v35, %v4304_v47  ;;  %v1345_v40 = vrot.slane %v1337_v36, %v4304_v47 }
 0x1e3   : > { %v1352_v42 = vrot.slane %v1338_v37, %v4304_v47  ;;  %v4364_v18 = vpop.f32.mrf.mxu1 }
 0x1e4   : > { %v1357_v43 = vcombine.low %v1329_v38, %v1336_v39  ;;  %v3316_v44 = vcombine.high %v1329_v38, %v1336_v39 }
 0x1e5   : > { %v1373_v45 = vcombine.low %v1345_v40, %v1352_v42  ;;  %v3317_v46 = vcombine.high %v1345_v40, %v1352_v42  ;;  %v3462_v20 = vpop.f32.mrf.mxu1  ;;  %v3294_v42 = vld [vmem:[#allocation14 + $0x2] ss:$0 sm:$0xff] }
 0x1e6   : > { %v1364_v48 = vrot.slane %v1357_v43, %v4302_v41  ;;  %v1372_v49 = vrot.slane %v3316_v44, %v4302_v41  ;;  %v1271_v52 = vld [vmem:[#allocation2] sm:$0xf]  ;;  %v1272_v53 = vld [vmem:[#allocation2 + $0x4] sm:$0xf] }
 0x1e7   : > { %v1380_v50 = vrot.slane %v1373_v45, %v4302_v41  ;;  %v1388_v51 = vrot.slane %v3317_v46, %v4302_v41  ;;  %v1434_v54 = vsel %vm1429_vm3, %v1271_v52, 0  ;;  %v1480_v55 = vsel %vm1429_vm3, %v1272_v53, 0  ;;  %v1273_v1 = vld [vmem:[#allocation2 + $0x8] sm:$0xf]  ;;  %v1274_v2 = vld [vmem:[#allocation2 + $0xc] sm:$0xf]  ;;  %v1047_v21 = vpop.f32.mrf.mxu1 }
 0x1e8   : > { %v1389_v56 = vcombine.low %v1364_v48, %v1372_v49  ;;  %3473 = vmatpush3.bf16.xpose.msra.mxu1 %v1434_v54  ;;  %3479 = vmatpush3.bf16.xpose.msra.mxu0 %v1480_v55  ;;  %v1390_v58 = vcombine.high %v1364_v48, %v1372_v49  ;;  %v1526_v7 = vsel %vm1429_vm3, %v1273_v1, 0  ;;  %v1572_v8 = vsel %vm1429_vm3, %v1274_v2, 0 }
 0x1e9   : > { %v1405_v57 = vcombine.low %v1380_v50, %v1388_v51  ;;  %3484 = vmatprep.subr.bf16.mxu1 %v4010_v0  ;;  %v1406_v59 = vcombine.high %v1380_v50, %v1388_v51  ;;  %3490 = vmatprep.subr.bf16.mxu0 %v4010_v0  ;;  %v3463_v22 = vpop.f32.mrf.mxu1  ;;  %v610_v45 = vadd.f32 %v3294_v42, %v609_v14 }
 0x1ea   : > { %v1397_v60 = vrot.slane %v1389_v56, %v4304_v47  ;;  %v1404_v5 = vrot.slane %v1390_v58, %v4304_v47 }
 0x1eb   : > { %v1413_v61 = vrot.slane %v1405_v57, %v4304_v47  ;;  %v1420_v6 = vrot.slane %v1406_v59, %v4304_v47 }
 0x1ed   : > { %v1421_v62 = vcombine.low %v1397_v60, %v1413_v61  ;;  %v1422_v63 = vcombine.high %v1397_v60, %v1413_v61  ;;  %v1423_v10 = vcombine.low %v1404_v5, %v1420_v6  ;;  %v1424_v11 = vcombine.high %v1404_v5, %v1420_v6 }
 0x1ef   : > { %v1425_v3 = vpack.c.bf16 %v1421_v62, %v1421_v62  ;;  %v1426_v4 = vpack.c.bf16 %v1422_v63, %v1422_v63  ;;  %v1427_v12 = vpack.c.bf16 %v1423_v10, %v1423_v10  ;;  %v1428_v13 = vpack.c.bf16 %v1424_v11, %v1424_v11 }
 0x1f1   : > { %3475 = vmatmul.mubr.msk.bf16.vlgmr.msra.gmra.mxu1 %vm1429_vm3, %v1425_v3  ;;  %3481 = vmatmul.mubr.msk.bf16.vlgmr.msra.gmra.mxu0 %vm1429_vm3, %v1426_v4 }
 0x1f2   : > { %3485 = vmatpush3.bf16.xpose.msra.mxu1 %v1526_v7  ;;  %3491 = vmatpush3.bf16.xpose.msra.mxu0 %v1572_v8 }
 0x1f3   : > { %3486 = vmatprep.mubr.msk.bf16.mxu1 %vm4011_vm0, %v4010_v0  ;;  %3492 = vmatprep.mubr.msk.bf16.mxu0 %vm4011_vm0, %v4010_v0 }
 0x1f4   : > { %3496 = vmatprep.subr.bf16.mxu1 %v4010_v0  ;;  %3502 = vmatprep.subr.bf16.mxu0 %v4010_v0 }
 0x1f9   : > { %3487 = vmatmul.mubr.msk.bf16.vlgmr.msra.gmra.mxu1 %vm1429_vm3, %v1427_v12  ;;  %3493 = vmatmul.mubr.msk.bf16.vlgmr.msra.gmra.mxu0 %vm1429_vm3, %v1428_v13 }
 0x1fa   : > { %3498 = vmatprep.mubr.msk.bf16.mxu1 %vm4011_vm0, %v4010_v0  ;;  %3504 = vmatprep.mubr.msk.bf16.mxu0 %vm4011_vm0, %v4010_v0 }
 0x2b1   : > { %v1470_v23 = vpop.f32.mrf.mxu1  ;;  %v1516_v24 = vpop.f32.mrf.mxu0 }
 0x2b2   : > { %v1614_v25 = vsel %vm1429_vm3, %v1470_v23, -inf  ;;  %v1617_v26 = vsel %vm1429_vm3, %v1516_v24, -inf }
 0x2b3   : > { %1615 = vmax.xlane.f32.xlu0 %v1614_v25  ;;  %v3476_v28 = vpop.f32.mrf.mxu1  ;;  %1618 = vmax.xlane.f32.xlu1 %v1617_v26  ;;  %v3482_v29 = vpop.f32.mrf.mxu0 }
 0x2b5   : > { %v1473_v30 = vpop.f32.mrf.mxu1  ;;  %v1519_v31 = vpop.f32.mrf.mxu0 }
 0x2b7   : > { %v3477_v32 = vpop.f32.mrf.mxu1  ;;  %v3483_v33 = vpop.f32.mrf.mxu0 }
 0x2b9   : > { %v1562_v27 = vpop.f32.mrf.mxu1  ;;  %v1608_v34 = vpop.f32.mrf.mxu0 }
 0x2ba   : > { %v1620_v35 = vsel %vm1429_vm3, %v1562_v27, -inf  ;;  %v1623_v40 = vsel %vm1429_vm3, %v1608_v34, -inf }
 0x2bb   : > { %1621 = vmax.xlane.f32.xlu0 %v1620_v35  ;;  %v3488_v36 = vpop.f32.mrf.mxu1  ;;  %v3494_v37 = vpop.f32.mrf.mxu0 }
 0x2bd   : > { %v1565_v38 = vpop.f32.mrf.mxu1  ;;  %v1611_v39 = vpop.f32.mrf.mxu0 }
 0x2bf   : > { %v3489_v43 = vpop.f32.mrf.mxu1  ;;  %1624 = vmax.xlane.f32.xlu0 %v1623_v40  ;;  %v3495_v44 = vpop.f32.mrf.mxu0 }
 0x2c4   : > { %616 = vrot.lane.b32.xlu1 %v610_v45, %s4013_s28 }
 0x2c8   : > { %622 = vrot.lane.b32.xlu1 %v610_v45, %s4012_s26 }
 0x2d5   : > { %619 = vrot.lane.b32.xlu0 %v610_v45, %s4014_s6 }
 0x33c   : > { %v1616_v46 = vpop.xlane.xlu0 %1615  ;;  %v1619_v48 = vpop.xlane.xlu1 %1618 }
 0x33d   : > { %v1626_v49 = vsub.f32 %v1470_v23, %v1616_v46  ;;  %v1627_v50 = vsub.f32 %v1516_v24, %v1619_v48 }
 0x33f   : > { %v1630_v51 = vmul.f32 1.442695, %v1626_v49  ;;  %v1632_v52 = vmul.f32 1.442695, %v1627_v50 }
 0x340   : > { %v617_v53 = vpop.permute.xlu1 %616 }
 0x341   : > { %3737 = vpow2.f32 %v1630_v51 }
 0x342   : > { %3739 = vpow2.f32 %v1632_v52 }
 0x344   : > { %v1622_v54 = vpop.xlane.xlu0 %1621  ;;  %v623_v57 = vpop.permute.xlu1 %622 }
 0x345   : > { %v1628_v55 = vsub.f32 %v1562_v27, %v1622_v54  ;;  %v641_v60 = vcombine.low %v617_v53, %v623_v57  ;;  %v642_v61 = vcombine.high %v617_v53, %v623_v57 }
 0x347   : > { %v1634_v56 = vmul.f32 1.442695, %v1628_v55  ;;  %v649_v4 = vrot.slane %v641_v60, %v4302_v41  ;;  %v656_v6 = vrot.slane %v642_v61, %v4302_v41 }
 0x348   : > { %v1625_v58 = vpop.xlane.xlu0 %1624 }
 0x349   : > { %3741 = vpow2.f32 %v1634_v56  ;;  %v1629_v59 = vsub.f32 %v1608_v34, %v1625_v58 }
 0x34b   : > { %v1636_v62 = vmul.f32 1.442695, %v1629_v59 }
 0x34c   : > { %v620_v63 = vpop.permute.xlu0 %619 }
 0x34d   : > { %3743 = vpow2.f32 %v1636_v62  ;;  %v625_v1 = vcombine.low %v610_v45, %v620_v63  ;;  %v626_v2 = vcombine.high %v610_v45, %v620_v63 }
 0x34e   : > { %v4373_v3 = vpop.eup %3737 }
 0x34f   : > { %v4376_v5 = vpop.eup %3739  ;;  %v633_v7 = vrot.slane %v625_v1, %v4302_v41  ;;  %v640_v8 = vrot.slane %v626_v2, %v4302_v41  ;;  %v1638_v10 = vsel %vm1429_vm3, %v4373_v3, 0.0 }
 0x350   : > { %1639 = vadd.xlane.f32.xlu1 %v1638_v10  ;;  %v1641_v11 = vsel %vm1429_vm3, %v4376_v5, 0.0 }
 0x351   : > { %v657_v12 = vcombine.low %v633_v7, %v649_v4  ;;  %v658_v13 = vcombine.high %v633_v7, %v649_v4  ;;  %v673_v14 = vcombine.low %v640_v8, %v656_v6  ;;  %v674_v15 = vcombine.high %v640_v8, %v656_v6  ;;  %1642 = vadd.xlane.f32.xlu0 %v1641_v11 }
 0x353   : > { %v665_v16 = vrot.slane %v657_v12, %v4304_v47  ;;  %v672_v17 = vrot.slane %v658_v13, %v4304_v47  ;;  %v681_v20 = vrot.slane %v673_v14, %v4304_v47  ;;  %v688_v21 = vrot.slane %v674_v15, %v4304_v47 }
 0x355   : > { %v693_v22 = vcombine.low %v665_v16, %v672_v17  ;;  %v3298_v23 = vcombine.high %v665_v16, %v672_v17  ;;  %v709_v24 = vcombine.low %v681_v20, %v688_v21  ;;  %v3299_v25 = vcombine.high %v681_v20, %v688_v21 }
 0x356   : > { %v4389_v26 = vpop.eup %3741 }
 0x357   : > { %v700_v28 = vrot.slane %v693_v22, %v4302_v41  ;;  %v708_v29 = vrot.slane %v3298_v23, %v4302_v41  ;;  %v716_v30 = vrot.slane %v709_v24, %v4302_v41  ;;  %v724_v31 = vrot.slane %v3299_v25, %v4302_v41 }
 0x358   : > { %v1644_v32 = vsel %vm1429_vm3, %v4389_v26, 0.0 }
 0x359   : > { %v725_v33 = vcombine.low %v700_v28, %v708_v29  ;;  %v726_v27 = vcombine.high %v700_v28, %v708_v29  ;;  %v741_v34 = vcombine.low %v716_v30, %v724_v31  ;;  %v742_v35 = vcombine.high %v716_v30, %v724_v31  ;;  %1645 = vadd.xlane.f32.xlu0 %v1644_v32 }
 0x35a   : > { %v3744_v36 = vpop.eup %3743 }
 0x35b   : > { %v733_v37 = vrot.slane %v725_v33, %v4304_v47  ;;  %v740_v38 = vrot.slane %v726_v27, %v4304_v47  ;;  %v749_v39 = vrot.slane %v741_v34, %v4304_v47  ;;  %v756_v40 = vrot.slane %v742_v35, %v4304_v47 }
 0x35c   : > { %v1647_v42 = vsel %vm1429_vm3, %v3744_v36, 0.0 }
 0x35d   : > { %v757_v43 = vcombine.low %v733_v37, %v749_v39  ;;  %v758_v44 = vcombine.high %v733_v37, %v749_v39  ;;  %v759_v45 = vcombine.low %v740_v38, %v756_v40  ;;  %v760_v46 = vcombine.high %v740_v38, %v756_v40  ;;  %1648 = vadd.xlane.f32.xlu1 %v1647_v42 }
 0x35f   : > { %v761_v48 = vpack.c.bf16 %v757_v43, %v757_v43  ;;  %v762_v49 = vpack.c.bf16 %v758_v44, %v758_v44  ;;  %v763_v50 = vpack.c.bf16 %v759_v45, %v759_v45  ;;  %v764_v51 = vpack.c.bf16 %v760_v46, %v760_v46  ;;  %v3727_v44 = vld [vmem:[#allocation12 + $0x38] sm:$0xff]  }
 0x361   : > { %765 = vst.msk [vmem:[#allocation3] sm:$0xf] %vm548_vm2, %v761_v48  ;;  %766 = vst.msk [vmem:[#allocation3 + $0x4] sm:$0xf] %vm548_vm2, %v762_v49 }
 0x362   : > { %767 = vst.msk [vmem:[#allocation3 + $0x8] sm:$0xf] %vm548_vm2, %v763_v50  ;;  %768 = vst.msk [vmem:[#allocation3 + $0xc] sm:$0xf] %vm548_vm2, %v764_v51 }
 0x368   : > { %v1275_v52 = vld [vmem:[#allocation3] sm:$0xf]  ;;  %v1276_v53 = vld [vmem:[#allocation3 + $0x4] sm:$0xf] }
 0x369   : > { %v1667_v54 = vsel %vm1665_vm4, %v1275_v52, 0  ;;  %v1713_v55 = vsel %vm1665_vm4, %v1276_v53, 0  ;;  %v1277_v1 = vld [vmem:[#allocation3 + $0x8] sm:$0xf]  ;;  %v1278_v4 = vld [vmem:[#allocation3 + $0xc] sm:$0xf] }
 0x36a   : > { %3497 = vmatpush3.bf16.msra.mxu1 %v1667_v54  ;;  %3503 = vmatpush3.bf16.msra.mxu0 %v1713_v55  ;;  %v1759_v7 = vsel %vm1665_vm4, %v1277_v1, 0  ;;  %v1805_v8 = vsel %vm1665_vm4, %v1278_v4, 0  ;;  %v3728_v55 = vld [vmem:[#allocation12 + $0x30] sm:$0xff]  }
 0x36b   : > { %3508 = vmatprep.subr.bf16.mxu1 %v4010_v0  ;;  %3514 = vmatprep.subr.bf16.mxu0 %v4010_v0 }
 0x3d9   : > { %v1640_v56 = vpop.xlane.xlu1 %1639 }
 0x3da   : > { %3745 = vrcp.f32 %v1640_v56  ;;  %v1643_v57 = vpop.xlane.xlu0 %1642 }
 0x3db   : > { %3747 = vrcp.f32 %v1643_v57 }
 0x3e2   : > { %v1646_v58 = vpop.xlane.xlu0 %1645 }
 0x3e3   : > { %3749 = vrcp.f32 %v1646_v58 }
 0x3e6   : > { %v1649_v59 = vpop.xlane.xlu1 %1648 }
 0x3e7   : > { %v3746_v60 = vpop.eup %3745  ;;  %3751 = vrcp.f32 %v1649_v59 }
 0x3e8   : > { %v3748_v61 = vpop.eup %3747  ;;  %v1654_v62 = vmul.f32 %v3746_v60, %v4373_v3 }
 0x3e9   : > { %v1655_v63 = vmul.f32 %v3748_v61, %v4376_v5 }
 0x3ea   : > { %v1658_v2 = vpack.c.bf16 %v1654_v62, %v1654_v62 }
 0x3eb   : > { %v1659_v6 = vpack.c.bf16 %v1655_v63, %v1655_v63 }
 0x3ec   : > { %3499 = vmatmul.mubr.msk.bf16.vlgmr.msra.gmra.mxu1 %vm1429_vm3, %v1658_v2 }
 0x3ed   : > { %3505 = vmatmul.mubr.msk.bf16.vlgmr.msra.gmra.mxu0 %vm1429_vm3, %v1659_v6  ;;  %3509 = vmatpush3.bf16.msra.mxu1 %v1759_v7 }
 0x3ee   : > { %3515 = vmatpush3.bf16.msra.mxu0 %v1805_v8  ;;  %3510 = vmatprep.mubr.msk.bf16.mxu1 %vm4011_vm0, %v4010_v0 }
 0x3ef   : > { %3516 = vmatprep.mubr.msk.bf16.mxu0 %vm4011_vm0, %v4010_v0  ;;  %3520 = vmatprep.subr.bf16.mxu1 %v4010_v0 }
 0x3f0   : > { %v3750_v3 = vpop.eup %3749  ;;  %3528 = vmatprep.subr.bf16.mxu0 %v4010_v0 }
 0x3f1   : > { %v1656_v5 = vmul.f32 %v3750_v3, %v4389_v26 }
 0x3f3   : > { %v1660_v10 = vpack.c.bf16 %v1656_v5, %v1656_v5 }
 0x3f4   : > { %v3752_v11 = vpop.eup %3751 }
 0x3f5   : > { %3511 = vmatmul.mubr.msk.bf16.vlgmr.msra.gmra.mxu1 %vm1429_vm3, %v1660_v10  ;;  %v1657_v12 = vmul.f32 %v3752_v11, %v3744_v36 }
 0x3f6   : > { %3524 = vmatprep.mubr.msk.bf16.mxu1 %vm4011_vm0, %v4010_v0  ;;  %3521 = vmatpush3.bf16.msra.mxu1 %v3727_v44 }
 0x3f7   : > { %v1661_v13 = vpack.c.bf16 %v1657_v12, %v1657_v12  ;;  %3522 = vmatprep.subr.bf16.mxu1 %v4010_v0 }
 0x3f9   : > { %3517 = vmatmul.mubr.msk.bf16.vlgmr.msra.gmra.mxu0 %vm1429_vm3, %v1661_v13 }
 0x3fa   : > { %3532 = vmatprep.mubr.msk.bf16.mxu0 %vm4011_vm0, %v4010_v0  ;;  %3523 = vmatpush3.bf16.msra.mxu1 %v3728_v55 }
 0x3fb   : > { %3536 = vmatprep.subr.bf16.mxu1 %v4010_v0 }
 0x4ac   : > { %v1703_v14 = vpop.f32.mrf.mxu1 }
 0x4ad   : > { %v1749_v15 = vpop.f32.mrf.mxu0 }
 0x4ae   : > { %v3500_v16 = vpop.f32.mrf.mxu1 }
 0x4af   : > { %v3506_v17 = vpop.f32.mrf.mxu0 }
 0x4b0   : > { %v1706_v20 = vpop.f32.mrf.mxu1  ;;  %v3328_v17 = vld [vmem:[#allocation14 + $0x3] ss:$0 sm:$0xff] }
 0x4b1   : > { %v1752_v21 = vpop.f32.mrf.mxu0 }
 0x4b2   : > { %v3501_v22 = vpop.f32.mrf.mxu1 }
 0x4b3   : > { %v3507_v23 = vpop.f32.mrf.mxu0 }
 0x4b5   : > { %v1795_v24 = vpop.f32.mrf.mxu1 }
 0x4b6   : > { %v1847_v26 = vcombine.low %v1703_v14, %v1795_v24  ;;  %v1848_v28 = vcombine.high %v1703_v14, %v1795_v24 }
 0x4b7   : > { %v3512_v25 = vpop.f32.mrf.mxu1 }
 0x4b8   : > { %v1855_v34 = vrot.slane %v1847_v26, %v4302_v41  ;;  %v1862_v35 = vrot.slane %v1848_v28, %v4302_v41  ;;  %v3300_v28 = vld [vmem:[#allocation14 + $0x7] ss:$0 sm:$0xff] }
 0x4b9   : > { %v1798_v29 = vpop.f32.mrf.mxu1  ;;  %v1841_v30 = vpop.f32.mrf.mxu0 }
 0x4ba   : > { %v1863_v31 = vcombine.low %v1749_v15, %v1841_v30  ;;  %v1864_v32 = vcombine.high %v1749_v15, %v1841_v30  ;;  %v829_v29 = vadd.f32 %v3300_v28, %v4284_v19 }
 0x4bb   : > { %v3513_v33 = vpop.f32.mrf.mxu1  ;;  %v3518_v27 = vpop.f32.mrf.mxu0 }
 0x4bc   : > { %v1871_v36 = vrot.slane %v1863_v31, %v4302_v41  ;;  %v1878_v37 = vrot.slane %v1864_v32, %v4302_v41 }
 0x4bd   : > { %v1844_v38 = vpop.f32.mrf.mxu0 }
 0x4be   : > { %v1879_v39 = vcombine.low %v1855_v34, %v1871_v36  ;;  %v1880_v40 = vcombine.high %v1855_v34, %v1871_v36  ;;  %v1895_v42 = vcombine.low %v1862_v35, %v1878_v37  ;;  %v1896_v43 = vcombine.high %v1862_v35, %v1878_v37  ;;  %v3730_v34 = vld [vmem:[#allocation12 + $0x40] sm:$0xff]  }
 0x4bf   : > { %v3519_v45 = vpop.f32.mrf.mxu0 }
 0x4c0   : > { %v1887_v46 = vrot.slane %v1879_v39, %v4304_v47  ;;  %v1894_v48 = vrot.slane %v1880_v40, %v4304_v47  ;;  %v1903_v49 = vrot.slane %v1895_v42, %v4304_v47  ;;  %v1910_v50 = vrot.slane %v1896_v43, %v4304_v47 }
 0x4c2   : > { %v1915_v51 = vcombine.low %v1887_v46, %v1894_v48  ;;  %v3326_v52 = vcombine.high %v1887_v46, %v1894_v48  ;;  %v1931_v53 = vcombine.low %v1903_v49, %v1910_v50  ;;  %v3327_v54 = vcombine.high %v1903_v49, %v1910_v50 }
 0x4c4   : > { %v1922_v56 = vrot.slane %v1915_v51, %v4302_v41  ;;  %v1930_v57 = vrot.slane %v3326_v52, %v4302_v41  ;;  %v1938_v58 = vrot.slane %v1931_v53, %v4302_v41  ;;  %v1946_v59 = vrot.slane %v3327_v54, %v4302_v41 }
 0x4c6   : > { %v1948_v60 = vcombine.high %v1922_v56, %v1930_v57  ;;  %v1964_v61 = vcombine.high %v1938_v58, %v1946_v59  ;;  %v1947_v62 = vcombine.low %v1922_v56, %v1930_v57  ;;  %v1963_v63 = vcombine.low %v1938_v58, %v1946_v59 }
 0x4c8   : > { %v1962_v1 = vrot.slane %v1948_v60, %v4304_v47  ;;  %v1978_v2 = vrot.slane %v1964_v61, %v4304_v47  ;;  %v1955_v4 = vrot.slane %v1947_v62, %v4304_v47  ;;  %v1971_v6 = vrot.slane %v1963_v63, %v4304_v47 }
 0x4ca   : > { %v1981_v7 = vcombine.low %v1962_v1, %v1978_v2  ;;  %v1980_v8 = vcombine.high %v1955_v4, %v1971_v6  ;;  %v1979_v3 = vcombine.low %v1955_v4, %v1971_v6  ;;  %v1982_v5 = vcombine.high %v1962_v1, %v1978_v2 }
 0x4cc   : > { %1988 = vrot.lane.b32.xlu1 %v1981_v7, %s4017_s8  ;;  %1984 = vrot.lane.b32.xlu0 %v1980_v8, %s4018_s13 }
 0x4d0   : > { %1992 = vrot.lane.b32.xlu1 %v1982_v5, %s4019_s14  ;;  %v3332_v5 = vld [vmem:[#allocation14 + $0x4] ss:$0 sm:$0xff] }
 0x53e   : > { %v1989_v10 = vpop.permute.xlu1 %1988  ;;  %v1985_v11 = vpop.permute.xlu0 %1984 }
 0x53f   : > { %v1995_v12 = vsel %vm1429_vm3, %v1979_v3, %v1985_v11 }
 0x540   : > { %v1997_v14 = vsel %vm1996_vm5, %v1995_v12, %v1989_v10 }
 0x542   : > { %v1993_v13 = vpop.permute.xlu1 %1992 }
 0x543   : > { %v1999_v15 = vsel %vm1998_vm6, %v1997_v14, %v1993_v13 }
 0x544   : > { %v2000_v16 = vpack.c.bf16 %v1999_v15, %v1999_v15  ;;  %v3333_v15 = vld [vmem:[#allocation14 + $0x5] ss:$0 sm:$0xff] }
 0x546   : > { %3525 = vmatmul.mubr.msk.bf16.vlgmr.msra.gmra.mxu1 %vm354_vm1, %v2000_v16 }
 0x547   : > { %3538 = vmatprep.mubr.msk.bf16.mxu1 %vm4011_vm0, %v4010_v0 }
 0x606   : > { %v2060_v20 = vpop.f32.mrf.mxu1 }
 0x607   : > { %v2061_v21 = vadd.f32 %v3328_v17, %v2060_v20 }
 0x608   : > { %v3526_v22 = vpop.f32.mrf.mxu1 }
 0x609   : > { %v2066_v23 = vadd.f32 %v2061_v21, %v4270_v9  ;;  %v3729_v9 = vld [vmem:[#allocation12 + $0x48] sm:$0xff]  }
 0x60a   : > { %v2063_v24 = vpop.f32.mrf.mxu1  ;;  %3529 = vmatpush3.bf16.msra.mxu0 %v3729_v9 }
 0x60b   : > { %v2069_v25 = vsel %vm354_vm1, %v2066_v23, 0.0  ;;  %3530 = vmatprep.subr.bf16.mxu0 %v4010_v0 }
 0x60c   : > { %2070 = vadd.xlane.f32.xlu0 %v2069_v25  ;;  %v3527_v26 = vpop.f32.mrf.mxu1 }
 0x60e   : > { %3531 = vmatpush3.bf16.msra.mxu0 %v3730_v34 }
 0x60f   : > { %3542 = vmatprep.subr.bf16.mxu0 %v4010_v0 }
 0x622   : > { %835 = vrot.lane.b32.xlu0 %v829_v29, %s4013_s28 }
 0x626   : > { %841 = vrot.lane.b32.xlu0 %v829_v29, %s4012_s26 }
 0x695   : > { %v2071_v30 = vpop.xlane.xlu0 %2070 }
 0x696   : > { %v2073_v31 = vmul.f32 0.03125, %v2071_v30 }
 0x698   : > { %v2074_v32 = vsub.f32 %v2066_v23, %v2073_v31 }
 0x699   : > { %v836_v19 = vpop.permute.xlu0 %835 }
 0x69a   : > { %v2075_v33 = vmul.f32 %v2074_v32, %v2074_v32 }
 0x69c   : > { %v2076_v27 = vsel %vm354_vm1, %v2075_v33, 0.0 }
 0x69d   : > { %2077 = vadd.xlane.f32.xlu1 %v2076_v27  ;;  %v842_v35 = vpop.permute.xlu0 %841  ;;  %v3334_v27 = vld [vmem:[#allocation14 + $0x6] ss:$0 sm:$0xff] }
 0x69e   : > { %v860_v38 = vcombine.low %v836_v19, %v842_v35  ;;  %v861_v39 = vcombine.high %v836_v19, %v842_v35 }
 0x6a0   : > { %v868_v45 = vrot.slane %v860_v38, %v4302_v41  ;;  %v875_v46 = vrot.slane %v861_v39, %v4302_v41 }
 0x6ae   : > { %838 = vrot.lane.b32.xlu1 %v829_v29, %s4014_s6 }
 0x726   : > { %v2078_v36 = vpop.xlane.xlu1 %2077 }
 0x727   : > { %v2079_v37 = vmul.f32 0.03125, %v2078_v36 }
 0x729   : > { %v2080_v40 = vadd.f32 1e-05, %v2079_v37 }
 0x72a   : > { %v839_v42 = vpop.permute.xlu1 %838 }
 0x72b   : > { %3753 = vrsqrt.f32 %v2080_v40  ;;  %v844_v43 = vcombine.low %v829_v29, %v839_v42  ;;  %v845_v44 = vcombine.high %v829_v29, %v839_v42 }
 0x72d   : > { %v852_v48 = vrot.slane %v844_v43, %v4302_v41  ;;  %v859_v49 = vrot.slane %v845_v44, %v4302_v41 }
 0x72f   : > { %v876_v50 = vcombine.low %v852_v48, %v868_v45  ;;  %v877_v51 = vcombine.high %v852_v48, %v868_v45  ;;  %v892_v52 = vcombine.low %v859_v49, %v875_v46  ;;  %v893_v53 = vcombine.high %v859_v49, %v875_v46 }
 0x731   : > { %v884_v54 = vrot.slane %v876_v50, %v4304_v47  ;;  %v891_v55 = vrot.slane %v877_v51, %v4304_v47  ;;  %v900_v56 = vrot.slane %v892_v52, %v4304_v47  ;;  %v907_v57 = vrot.slane %v893_v53, %v4304_v47 }
 0x733   : > { %v912_v58 = vcombine.low %v884_v54, %v891_v55  ;;  %v3304_v59 = vcombine.high %v884_v54, %v891_v55  ;;  %v928_v60 = vcombine.low %v900_v56, %v907_v57  ;;  %v3305_v61 = vcombine.high %v900_v56, %v907_v57 }
 0x735   : > { %v919_v62 = vrot.slane %v912_v58, %v4302_v41  ;;  %v927_v63 = vrot.slane %v3304_v59, %v4302_v41  ;;  %v935_v1 = vrot.slane %v928_v60, %v4302_v41  ;;  %v943_v2 = vrot.slane %v3305_v61, %v4302_v41 }
 0x737   : > { %v944_v4 = vcombine.low %v919_v62, %v927_v63  ;;  %v945_v6 = vcombine.high %v919_v62, %v927_v63  ;;  %v960_v7 = vcombine.low %v935_v1, %v943_v2  ;;  %v961_v8 = vcombine.high %v935_v1, %v943_v2 }
 0x738   : > { %v3754_v3 = vpop.eup %3753 }
 0x739   : > { %v2082_v10 = vmul.f32 %v3754_v3, %v2074_v32  ;;  %v952_v11 = vrot.slane %v944_v4, %v4304_v47  ;;  %v959_v12 = vrot.slane %v945_v6, %v4304_v47  ;;  %v968_v13 = vrot.slane %v960_v7, %v4304_v47 }
 0x73a   : > { %v975_v14 = vrot.slane %v961_v8, %v4304_v47 }
 0x73b   : > { %v976_v16 = vcombine.low %v952_v11, %v968_v13  ;;  %v977_v17 = vcombine.high %v952_v11, %v968_v13  ;;  %v2087_v20 = vmul.f32 %v3332_v5, %v2082_v10 }
 0x73c   : > { %v978_v21 = vcombine.low %v959_v12, %v975_v14  ;;  %v979_v22 = vcombine.high %v959_v12, %v975_v14 }
 0x73d   : > { %v980_v23 = vpack.c.bf16 %v976_v16, %v976_v16  ;;  %v981_v24 = vpack.c.bf16 %v977_v17, %v977_v17  ;;  %v4481_v25 = vadd.f32 %v3333_v15, %v2087_v20 }
 0x73e   : > { %v982_v26 = vpack.c.bf16 %v978_v21, %v978_v21  ;;  %v983_v28 = vpack.c.bf16 %v979_v22, %v979_v22 }
 0x73f   : > { %984 = vst.msk [vmem:[#allocation4] sm:$0xf] %vm548_vm2, %v980_v23  ;;  %985 = vst.msk [vmem:[#allocation4 + $0x4] sm:$0xf] %vm548_vm2, %v981_v24  ;;  %v2093_v29 = vpack.c.bf16 %v4481_v25, %v4481_v25 }
 0x740   : > { %986 = vst.msk [vmem:[#allocation4 + $0x8] sm:$0xf] %vm548_vm2, %v982_v26  ;;  %987 = vst.msk [vmem:[#allocation4 + $0xc] sm:$0xf] %vm548_vm2, %v983_v28 }
 0x741   : > { %3533 = vmatmul.mubr.msk.bf16.vlgmr.msra.gmra.mxu0 %vm354_vm1, %v2093_v29 }
 0x742   : > { %3544 = vmatprep.mubr.msk.bf16.mxu0 %vm4011_vm0, %v4010_v0 }
 0x746   : > { %v2159_v30 = vld [vmem:[#allocation4] sm:$0xf]  ;;  %v2160_v31 = vld [vmem:[#allocation4 + $0x4] sm:$0xf] }
 0x747   : > { %v2321_v32 = vsel %vm1429_vm3, %v2159_v30, 0  ;;  %v2367_v33 = vsel %vm1429_vm3, %v2160_v31, 0  ;;  %v2161_v12 = vld [vmem:[#allocation4 + $0x8] sm:$0xf]  ;;  %v2162_v13 = vld [vmem:[#allocation4 + $0xc] sm:$0xf] }
 0x748   : > { %3537 = vmatpush3.bf16.xpose.msra.mxu1 %v2321_v32  ;;  %3543 = vmatpush3.bf16.xpose.msra.mxu0 %v2367_v33  ;;  %v2413_v20 = vsel %vm1429_vm3, %v2161_v12, 0  ;;  %v2459_v21 = vsel %vm1429_vm3, %v2162_v13, 0 }
 0x749   : > { %3548 = vmatprep.subr.bf16.mxu1 %v4010_v0  ;;  %3554 = vmatprep.subr.bf16.mxu0 %v4010_v0 }
 0x801   : > { %v2153_v9 = vpop.f32.mrf.mxu0 }
 0x802   : > { %v2154_v34 = vadd.f32 %v3334_v27, %v2153_v9 }
 0x803   : > { %v3534_v19 = vpop.f32.mrf.mxu0 }
 0x804   : > { %2171 = vrot.lane.b32.xlu0 %v2154_v34, %s4014_s6  ;;  %2168 = vrot.lane.b32.xlu1 %v2154_v34, %s4013_s28 }
 0x805   : > { %v2156_v35 = vpop.f32.mrf.mxu0 }
 0x807   : > { %v3535_v36 = vpop.f32.mrf.mxu0 }
 0x808   : > { %2174 = vrot.lane.b32.xlu1 %v2154_v34, %s4012_s26 }
 0x876   : > { %v2172_v37 = vpop.permute.xlu0 %2171  ;;  %v2169_v38 = vpop.permute.xlu1 %2168 }
 0x877   : > { %v2177_v39 = vcombine.low %v2154_v34, %v2172_v37  ;;  %v2178_v40 = vcombine.high %v2154_v34, %v2172_v37 }
 0x879   : > { %v2185_v45 = vrot.slane %v2177_v39, %v4302_v41  ;;  %v2192_v46 = vrot.slane %v2178_v40, %v4302_v41 }
 0x87a   : > { %v2175_v42 = vpop.permute.xlu1 %2174 }
 0x87b   : > { %v2193_v43 = vcombine.low %v2169_v38, %v2175_v42  ;;  %v2194_v44 = vcombine.high %v2169_v38, %v2175_v42 }
 0x87d   : > { %v2201_v48 = vrot.slane %v2193_v43, %v4302_v41  ;;  %v2208_v49 = vrot.slane %v2194_v44, %v4302_v41  ;;  %v3306_v44 = vld [vmem:[#allocation14 + $0x8] ss:$0 sm:$0xff] }
 0x87f   : > { %v2209_v50 = vcombine.low %v2185_v45, %v2201_v48  ;;  %v2210_v51 = vcombine.high %v2185_v45, %v2201_v48  ;;  %v2225_v52 = vcombine.low %v2192_v46, %v2208_v49  ;;  %v2226_v53 = vcombine.high %v2192_v46, %v2208_v49 }
 0x880   : > { %v1045_v48 = vadd.f32 %v3306_v44, %v4364_v18 }
 0x881   : > { %v2217_v54 = vrot.slane %v2209_v50, %v4304_v47  ;;  %v2224_v55 = vrot.slane %v2210_v51, %v4304_v47  ;;  %v2233_v56 = vrot.slane %v2225_v52, %v4304_v47  ;;  %v2240_v57 = vrot.slane %v2226_v53, %v4304_v47 }
 0x883   : > { %v2245_v58 = vcombine.low %v2217_v54, %v2224_v55  ;;  %v3338_v59 = vcombine.high %v2217_v54, %v2224_v55  ;;  %v2261_v60 = vcombine.low %v2233_v56, %v2240_v57  ;;  %v3339_v61 = vcombine.high %v2233_v56, %v2240_v57 }
 0x885   : > { %v2252_v62 = vrot.slane %v2245_v58, %v4302_v41  ;;  %v2260_v63 = vrot.slane %v3338_v59, %v4302_v41  ;;  %v2268_v1 = vrot.slane %v2261_v60, %v4302_v41  ;;  %v2276_v2 = vrot.slane %v3339_v61, %v4302_v41 }
 0x887   : > { %v2277_v4 = vcombine.low %v2252_v62, %v2260_v63  ;;  %v2293_v6 = vcombine.low %v2268_v1, %v2276_v2  ;;  %v2278_v7 = vcombine.high %v2252_v62, %v2260_v63  ;;  %v2294_v8 = vcombine.high %v2268_v1, %v2276_v2 }
 0x889   : > { %v2285_v3 = vrot.slane %v2277_v4, %v4304_v47  ;;  %v2301_v5 = vrot.slane %v2293_v6, %v4304_v47  ;;  %v2292_v16 = vrot.slane %v2278_v7, %v4304_v47  ;;  %v2308_v17 = vrot.slane %v2294_v8, %v4304_v47 }
 0x88b   : > { %v2309_v10 = vcombine.low %v2285_v3, %v2301_v5  ;;  %v2310_v11 = vcombine.high %v2285_v3, %v2301_v5  ;;  %v2311_v22 = vcombine.low %v2292_v16, %v2308_v17  ;;  %v2312_v23 = vcombine.high %v2292_v16, %v2308_v17 }
 0x88d   : > { %v2313_v14 = vpack.c.bf16 %v2309_v10, %v2309_v10  ;;  %v2314_v15 = vpack.c.bf16 %v2310_v11, %v2310_v11  ;;  %v2315_v24 = vpack.c.bf16 %v2311_v22, %v2311_v22  ;;  %v2316_v26 = vpack.c.bf16 %v2312_v23, %v2312_v23 }
 0x88f   : > { %3539 = vmatmul.mubr.msk.bf16.vlgmr.msra.gmra.mxu1 %vm1429_vm3, %v2313_v14  ;;  %3545 = vmatmul.mubr.msk.bf16.vlgmr.msra.gmra.mxu0 %vm1429_vm3, %v2314_v15 }
 0x890   : > { %3549 = vmatpush3.bf16.xpose.msra.mxu1 %v2413_v20  ;;  %3555 = vmatpush3.bf16.xpose.msra.mxu0 %v2459_v21 }
 0x891   : > { %3550 = vmatprep.mubr.msk.bf16.mxu1 %vm4011_vm0, %v4010_v0  ;;  %3556 = vmatprep.mubr.msk.bf16.mxu0 %vm4011_vm0, %v4010_v0 }
 0x892   : > { %3560 = vmatprep.subr.bf16.mxu1 %v4010_v0  ;;  %3566 = vmatprep.subr.bf16.mxu0 %v4010_v0 }
 0x897   : > { %3551 = vmatmul.mubr.msk.bf16.vlgmr.msra.gmra.mxu1 %vm1429_vm3, %v2315_v24  ;;  %3557 = vmatmul.mubr.msk.bf16.vlgmr.msra.gmra.mxu0 %vm1429_vm3, %v2316_v26 }
 0x898   : > { %3562 = vmatprep.mubr.msk.bf16.mxu1 %vm4011_vm0, %v4010_v0  ;;  %3568 = vmatprep.mubr.msk.bf16.mxu0 %vm4011_vm0, %v4010_v0 }
 0x94f   : > { %v2357_v28 = vpop.f32.mrf.mxu1  ;;  %v2403_v29 = vpop.f32.mrf.mxu0 }
 0x950   : > { %v2501_v30 = vsel %vm1429_vm3, %v2357_v28, -inf  ;;  %v2504_v31 = vsel %vm1429_vm3, %v2403_v29, -inf }
 0x951   : > { %2502 = vmax.xlane.f32.xlu0 %v2501_v30  ;;  %v3540_v32 = vpop.f32.mrf.mxu1  ;;  %2505 = vmax.xlane.f32.xlu1 %v2504_v31  ;;  %v3546_v33 = vpop.f32.mrf.mxu0 }
 0x953   : > { %v2360_v27 = vpop.f32.mrf.mxu1  ;;  %v2406_v9 = vpop.f32.mrf.mxu0 }
 0x955   : > { %v3541_v34 = vpop.f32.mrf.mxu1  ;;  %v3547_v19 = vpop.f32.mrf.mxu0 }
 0x957   : > { %v2449_v35 = vpop.f32.mrf.mxu1  ;;  %v2495_v36 = vpop.f32.mrf.mxu0 }
 0x958   : > { %v2507_v37 = vsel %vm1429_vm3, %v2449_v35, -inf  ;;  %v2510_v43 = vsel %vm1429_vm3, %v2495_v36, -inf }
 0x959   : > { %2508 = vmax.xlane.f32.xlu0 %v2507_v37  ;;  %v3552_v38 = vpop.f32.mrf.mxu1  ;;  %v3558_v39 = vpop.f32.mrf.mxu0 }
 0x95b   : > { %v2452_v40 = vpop.f32.mrf.mxu1  ;;  %v2498_v42 = vpop.f32.mrf.mxu0 }
 0x95d   : > { %v3553_v45 = vpop.f32.mrf.mxu1  ;;  %2511 = vmax.xlane.f32.xlu0 %v2510_v43  ;;  %v3559_v46 = vpop.f32.mrf.mxu0 }
 0x962   : > { %1051 = vrot.lane.b32.xlu1 %v1045_v48, %s4013_s28 }
 0x966   : > { %1057 = vrot.lane.b32.xlu1 %v1045_v48, %s4012_s26 }
 0x973   : > { %1054 = vrot.lane.b32.xlu0 %v1045_v48, %s4014_s6 }
 0x9da   : > { %v2503_v49 = vpop.xlane.xlu0 %2502  ;;  %v2506_v50 = vpop.xlane.xlu1 %2505 }
 0x9db   : > { %v2513_v51 = vsub.f32 %v2357_v28, %v2503_v49  ;;  %v2514_v52 = vsub.f32 %v2403_v29, %v2506_v50 }
 0x9dd   : > { %v2517_v53 = vmul.f32 1.442695, %v2513_v51  ;;  %v2519_v54 = vmul.f32 1.442695, %v2514_v52 }
 0x9de   : > { %v1052_v55 = vpop.permute.xlu1 %1051 }
 0x9df   : > { %3755 = vpow2.f32 %v2517_v53 }
 0x9e0   : > { %3757 = vpow2.f32 %v2519_v54 }
 0x9e2   : > { %v2509_v56 = vpop.xlane.xlu0 %2508  ;;  %v1058_v59 = vpop.permute.xlu1 %1057 }
 0x9e3   : > { %v2515_v57 = vsub.f32 %v2449_v35, %v2509_v56  ;;  %v1076_v61 = vcombine.low %v1052_v55, %v1058_v59  ;;  %v1077_v62 = vcombine.high %v1052_v55, %v1058_v59 }
 0x9e5   : > { %v2521_v58 = vmul.f32 1.442695, %v2515_v57  ;;  %v1084_v7 = vrot.slane %v1076_v61, %v4302_v41  ;;  %v1091_v3 = vrot.slane %v1077_v62, %v4302_v41 }
 0x9e6   : > { %v2512_v18 = vpop.xlane.xlu0 %2511 }
 0x9e7   : > { %3759 = vpow2.f32 %v2521_v58  ;;  %v2516_v60 = vsub.f32 %v2495_v36, %v2512_v18 }
 0x9e9   : > { %v2523_v63 = vmul.f32 1.442695, %v2516_v60 }
 0x9ea   : > { %v1055_v1 = vpop.permute.xlu0 %1054 }
 0x9eb   : > { %3761 = vpow2.f32 %v2523_v63  ;;  %v1060_v2 = vcombine.low %v1045_v48, %v1055_v1  ;;  %v1061_v4 = vcombine.high %v1045_v48, %v1055_v1 }
 0x9ec   : > { %v4539_v6 = vpop.eup %3755 }
 0x9ed   : > { %v4542_v8 = vpop.eup %3757  ;;  %v1068_v5 = vrot.slane %v1060_v2, %v4302_v41  ;;  %v1075_v10 = vrot.slane %v1061_v4, %v4302_v41  ;;  %v2525_v11 = vsel %vm1429_vm3, %v4539_v6, 0.0 }
 0x9ee   : > { %2526 = vadd.xlane.f32.xlu1 %v2525_v11  ;;  %v2528_v12 = vsel %vm1429_vm3, %v4542_v8, 0.0 }
 0x9ef   : > { %v1092_v13 = vcombine.low %v1068_v5, %v1084_v7  ;;  %v1093_v14 = vcombine.high %v1068_v5, %v1084_v7  ;;  %v1108_v15 = vcombine.low %v1075_v10, %v1091_v3  ;;  %v1109_v16 = vcombine.high %v1075_v10, %v1091_v3  ;;  %2529 = vadd.xlane.f32.xlu0 %v2528_v12 }
 0x9f1   : > { %v1100_v17 = vrot.slane %v1092_v13, %v4304_v47  ;;  %v1107_v20 = vrot.slane %v1093_v14, %v4304_v47  ;;  %v1116_v21 = vrot.slane %v1108_v15, %v4304_v47  ;;  %v1123_v22 = vrot.slane %v1109_v16, %v4304_v47 }
 0x9f3   : > { %v1128_v23 = vcombine.low %v1100_v17, %v1107_v20  ;;  %v3310_v24 = vcombine.high %v1100_v17, %v1107_v20  ;;  %v1144_v26 = vcombine.low %v1116_v21, %v1123_v22  ;;  %v3311_v28 = vcombine.high %v1116_v21, %v1123_v22 }
 0x9f4   : > { %v4555_v29 = vpop.eup %3759 }
 0x9f5   : > { %v1135_v30 = vrot.slane %v1128_v23, %v4302_v41  ;;  %v1143_v31 = vrot.slane %v3310_v24, %v4302_v41  ;;  %v1151_v32 = vrot.slane %v1144_v26, %v4302_v41  ;;  %v1159_v33 = vrot.slane %v3311_v28, %v4302_v41 }
 0x9f6   : > { %v2531_v27 = vsel %vm1429_vm3, %v4555_v29, 0.0 }
 0x9f7   : > { %v1160_v9 = vcombine.low %v1135_v30, %v1143_v31  ;;  %v1161_v34 = vcombine.high %v1135_v30, %v1143_v31  ;;  %v1176_v19 = vcombine.low %v1151_v32, %v1159_v33  ;;  %v1177_v35 = vcombine.high %v1151_v32, %v1159_v33  ;;  %2532 = vadd.xlane.f32.xlu0 %v2531_v27 }
 0x9f8   : > { %v3762_v36 = vpop.eup %3761 }
 0x9f9   : > { %v1168_v37 = vrot.slane %v1160_v9, %v4304_v47  ;;  %v1175_v38 = vrot.slane %v1161_v34, %v4304_v47  ;;  %v1184_v39 = vrot.slane %v1176_v19, %v4304_v47  ;;  %v1191_v40 = vrot.slane %v1177_v35, %v4304_v47 }
 0x9fa   : > { %v2534_v42 = vsel %vm1429_vm3, %v3762_v36, 0.0 }
 0x9fb   : > { %v1192_v43 = vcombine.low %v1168_v37, %v1184_v39  ;;  %v1193_v44 = vcombine.high %v1168_v37, %v1184_v39  ;;  %v1194_v45 = vcombine.low %v1175_v38, %v1191_v40  ;;  %v1195_v46 = vcombine.high %v1175_v38, %v1191_v40  ;;  %2535 = vadd.xlane.f32.xlu1 %v2534_v42  ;;  %v3731_v42 = vld [vmem:[#allocation12 + $0x78] sm:$0xff]  }
 0x9fd   : > { %v1196_v48 = vpack.c.bf16 %v1192_v43, %v1192_v43  ;;  %v1197_v49 = vpack.c.bf16 %v1193_v44, %v1193_v44  ;;  %v1198_v50 = vpack.c.bf16 %v1194_v45, %v1194_v45  ;;  %v1199_v51 = vpack.c.bf16 %v1195_v46, %v1195_v46 }
 0x9ff   : > { %1200 = vst.msk [vmem:[#allocation5] sm:$0xf] %vm548_vm2, %v1196_v48  ;;  %1201 = vst.msk [vmem:[#allocation5 + $0x4] sm:$0xf] %vm548_vm2, %v1197_v49 }
 0xa00   : > { %1202 = vst.msk [vmem:[#allocation5 + $0x8] sm:$0xf] %vm548_vm2, %v1198_v50  ;;  %1203 = vst.msk [vmem:[#allocation5 + $0xc] sm:$0xf] %vm548_vm2, %v1199_v51 }
 0xa06   : > { %v2163_v52 = vld [vmem:[#allocation5] sm:$0xf]  ;;  %v2164_v53 = vld [vmem:[#allocation5 + $0x4] sm:$0xf] }
 0xa07   : > { %v2553_v54 = vsel %vm1665_vm4, %v2163_v52, 0  ;;  %v2599_v55 = vsel %vm1665_vm4, %v2164_v53, 0  ;;  %v2165_v63 = vld [vmem:[#allocation5 + $0x8] sm:$0xf]  ;;  %v2166_v2 = vld [vmem:[#allocation5 + $0xc] sm:$0xf] }
 0xa08   : > { %3561 = vmatpush3.bf16.msra.mxu1 %v2553_v54  ;;  %3567 = vmatpush3.bf16.msra.mxu0 %v2599_v55  ;;  %v2645_v7 = vsel %vm1665_vm4, %v2165_v63, 0  ;;  %v2691_v3 = vsel %vm1665_vm4, %v2166_v2, 0  ;;  %v3732_v53 = vld [vmem:[#allocation12 + $0x70] sm:$0xff]  }
 0xa09   : > { %3572 = vmatprep.subr.bf16.mxu1 %v4010_v0  ;;  %3578 = vmatprep.subr.bf16.mxu0 %v4010_v0 }
 0xa77   : > { %v2527_v56 = vpop.xlane.xlu1 %2526 }
 0xa78   : > { %3763 = vrcp.f32 %v2527_v56  ;;  %v2530_v57 = vpop.xlane.xlu0 %2529 }
 0xa79   : > { %3765 = vrcp.f32 %v2530_v57 }
 0xa80   : > { %v2533_v58 = vpop.xlane.xlu0 %2532 }
 0xa81   : > { %3767 = vrcp.f32 %v2533_v58 }
 0xa84   : > { %v2536_v59 = vpop.xlane.xlu1 %2535 }
 0xa85   : > { %v3764_v18 = vpop.eup %3763  ;;  %3769 = vrcp.f32 %v2536_v59 }
 0xa86   : > { %v3766_v60 = vpop.eup %3765  ;;  %v2541_v61 = vmul.f32 %v3764_v18, %v4539_v6 }
 0xa87   : > { %v2542_v62 = vmul.f32 %v3766_v60, %v4542_v8 }
 0xa88   : > { %v2545_v1 = vpack.c.bf16 %v2541_v61, %v2541_v61 }
 0xa89   : > { %v2546_v4 = vpack.c.bf16 %v2542_v62, %v2542_v62 }
 0xa8a   : > { %3563 = vmatmul.mubr.msk.bf16.vlgmr.msra.gmra.mxu1 %vm1429_vm3, %v2545_v1 }
 0xa8b   : > { %3569 = vmatmul.mubr.msk.bf16.vlgmr.msra.gmra.mxu0 %vm1429_vm3, %v2546_v4  ;;  %3573 = vmatpush3.bf16.msra.mxu1 %v2645_v7 }
 0xa8c   : > { %3579 = vmatpush3.bf16.msra.mxu0 %v2691_v3  ;;  %3574 = vmatprep.mubr.msk.bf16.mxu1 %vm4011_vm0, %v4010_v0 }
 0xa8d   : > { %3580 = vmatprep.mubr.msk.bf16.mxu0 %vm4011_vm0, %v4010_v0  ;;  %3584 = vmatprep.subr.bf16.mxu1 %v4010_v0 }
 0xa8e   : > { %v3768_v6 = vpop.eup %3767  ;;  %3592 = vmatprep.subr.bf16.mxu0 %v4010_v0 }
 0xa8f   : > { %v2543_v8 = vmul.f32 %v3768_v6, %v4555_v29 }
 0xa91   : > { %v2547_v5 = vpack.c.bf16 %v2543_v8, %v2543_v8 }
 0xa92   : > { %v3770_v10 = vpop.eup %3769 }
 0xa93   : > { %3575 = vmatmul.mubr.msk.bf16.vlgmr.msra.gmra.mxu1 %vm1429_vm3, %v2547_v5  ;;  %v2544_v11 = vmul.f32 %v3770_v10, %v3762_v36 }
 0xa94   : > { %3588 = vmatprep.mubr.msk.bf16.mxu1 %vm4011_vm0, %v4010_v0  ;;  %3585 = vmatpush3.bf16.msra.mxu1 %v3731_v42 }
 0xa95   : > { %v2548_v12 = vpack.c.bf16 %v2544_v11, %v2544_v11  ;;  %3586 = vmatprep.subr.bf16.mxu1 %v4010_v0 }
 0xa97   : > { %3581 = vmatmul.mubr.msk.bf16.vlgmr.msra.gmra.mxu0 %vm1429_vm3, %v2548_v12  ;;  %v3350_v12 = vld [vmem:[#allocation14 + $0x9] ss:$0 sm:$0xff] }
 0xa98   : > { %3596 = vmatprep.mubr.msk.bf16.mxu0 %vm4011_vm0, %v4010_v0  ;;  %3587 = vmatpush3.bf16.msra.mxu1 %v3732_v53 }
 0xa99   : > { %3600 = vmatprep.subr.bf16.mxu1 %v4010_v0 }
 0xb4a   : > { %v2589_v13 = vpop.f32.mrf.mxu1 }
 0xb4b   : > { %v2635_v14 = vpop.f32.mrf.mxu0 }
 0xb4c   : > { %v3564_v15 = vpop.f32.mrf.mxu1 }
 0xb4d   : > { %v3570_v16 = vpop.f32.mrf.mxu0 }
 0xb4e   : > { %v2592_v17 = vpop.f32.mrf.mxu1 }
 0xb4f   : > { %v2638_v20 = vpop.f32.mrf.mxu0 }
 0xb50   : > { %v3565_v21 = vpop.f32.mrf.mxu1 }
 0xb51   : > { %v3571_v22 = vpop.f32.mrf.mxu0 }
 0xb53   : > { %v2681_v23 = vpop.f32.mrf.mxu1 }
 0xb54   : > { %v2733_v26 = vcombine.low %v2589_v13, %v2681_v23  ;;  %v2734_v28 = vcombine.high %v2589_v13, %v2681_v23 }
 0xb55   : > { %v3576_v24 = vpop.f32.mrf.mxu1 }
 0xb56   : > { %v2741_v9 = vrot.slane %v2733_v26, %v4302_v41  ;;  %v2748_v34 = vrot.slane %v2734_v28, %v4302_v41 }
 0xb57   : > { %v2684_v29 = vpop.f32.mrf.mxu1  ;;  %v2727_v30 = vpop.f32.mrf.mxu0 }
 0xb58   : > { %v2749_v31 = vcombine.low %v2635_v14, %v2727_v30  ;;  %v2750_v32 = vcombine.high %v2635_v14, %v2727_v30  ;;  %v3733_v29 = vld [vmem:[#allocation12 + $0x88] sm:$0xff]   ;;  %v3734_v30 = vld [vmem:[#allocation12 + $0x80] sm:$0xff]  }
 0xb59   : > { %v3577_v33 = vpop.f32.mrf.mxu1  ;;  %v3582_v27 = vpop.f32.mrf.mxu0  ;;  %3593 = vmatpush3.bf16.msra.mxu0 %v3733_v29 }
 0xb5a   : > { %v2757_v19 = vrot.slane %v2749_v31, %v4302_v41  ;;  %v2764_v35 = vrot.slane %v2750_v32, %v4302_v41  ;;  %3594 = vmatprep.subr.bf16.mxu0 %v4010_v0  ;;  %v3354_v27 = vld [vmem:[#allocation14 + $0xa] ss:$0 sm:$0xff] }
 0xb5b   : > { %v2730_v36 = vpop.f32.mrf.mxu0 }
 0xb5c   : > { %v2765_v37 = vcombine.low %v2741_v9, %v2757_v19  ;;  %v2766_v38 = vcombine.high %v2741_v9, %v2757_v19  ;;  %v2781_v39 = vcombine.low %v2748_v34, %v2764_v35  ;;  %v2782_v40 = vcombine.high %v2748_v34, %v2764_v35  ;;  %v3355_v34 = vld [vmem:[#allocation14 + $0xb] ss:$0 sm:$0xff] }
 0xb5d   : > { %v3583_v43 = vpop.f32.mrf.mxu0  ;;  %3595 = vmatpush3.bf16.msra.mxu0 %v3734_v30 }
 0xb5e   : > { %v2773_v44 = vrot.slane %v2765_v37, %v4304_v47  ;;  %v2780_v45 = vrot.slane %v2766_v38, %v4304_v47  ;;  %v2789_v46 = vrot.slane %v2781_v39, %v4304_v47  ;;  %v2796_v48 = vrot.slane %v2782_v40, %v4304_v47  ;;  %v3735_v37 = vld [vmem:[#allocation12 + $0x98] sm:$0xff]   ;;  %v3736_v38 = vld [vmem:[#allocation12 + $0x90] sm:$0xff]   ;;  %v3356_v39 = vld [vmem:[#allocation14 + $0xc] ss:$0 sm:$0xff] }
 0xb60   : > { %v2801_v49 = vcombine.low %v2773_v44, %v2780_v45  ;;  %v3348_v50 = vcombine.high %v2773_v44, %v2780_v45  ;;  %v2817_v51 = vcombine.low %v2789_v46, %v2796_v48  ;;  %v3349_v52 = vcombine.high %v2789_v46, %v2796_v48 }
 0xb62   : > { %v2808_v54 = vrot.slane %v2801_v49, %v4302_v41  ;;  %v2816_v55 = vrot.slane %v3348_v50, %v4302_v41  ;;  %v2824_v56 = vrot.slane %v2817_v51, %v4302_v41  ;;  %v2832_v57 = vrot.slane %v3349_v52, %v4302_v41  ;;  %v3360_v49 = vld [vmem:[#allocation14 + $0xd] ss:$0 sm:$0xff] }
 0xb64   : > { %v2834_v58 = vcombine.high %v2808_v54, %v2816_v55  ;;  %v2850_v59 = vcombine.high %v2824_v56, %v2832_v57  ;;  %v2833_v18 = vcombine.low %v2808_v54, %v2816_v55  ;;  %v2849_v60 = vcombine.low %v2824_v56, %v2832_v57 }
 0xb66   : > { %v2848_v61 = vrot.slane %v2834_v58, %v4304_v47  ;;  %v2864_v62 = vrot.slane %v2850_v59, %v4304_v47  ;;  %v2841_v63 = vrot.slane %v2833_v18, %v4304_v47  ;;  %v2857_v1 = vrot.slane %v2849_v60, %v4304_v47 }
 0xb68   : > { %v2867_v2 = vcombine.low %v2848_v61, %v2864_v62  ;;  %v2866_v4 = vcombine.high %v2841_v63, %v2857_v1  ;;  %v2865_v7 = vcombine.low %v2841_v63, %v2857_v1  ;;  %v2868_v41 = vcombine.high %v2848_v61, %v2864_v62  ;;  %v3364_v1 = vld [vmem:[#allocation14 + $0xe] ss:$0 sm:$0xff] }
 0xb6a   : > { %2874 = vrot.lane.b32.xlu1 %v2867_v2, %s4017_s8  ;;  %2870 = vrot.lane.b32.xlu0 %v2866_v4, %s4018_s13  ;;  %v3365_v4 = vld [vmem:[#allocation14 + $0xf] ss:$0 sm:$0xff] }
 0xb6e   : > { %2878 = vrot.lane.b32.xlu1 %v2868_v41, %s4019_s14 }
 0xbdc   : > { %v2875_v3 = vpop.permute.xlu1 %2874  ;;  %v2871_v6 = vpop.permute.xlu0 %2870 }
 0xbdd   : > { %v2881_v8 = vsel %vm1429_vm3, %v2865_v7, %v2871_v6 }
 0xbde   : > { %v2882_v10 = vsel %vm1996_vm5, %v2881_v8, %v2875_v3 }
 0xbe0   : > { %v2879_v5 = vpop.permute.xlu1 %2878 }
 0xbe1   : > { %v2883_v11 = vsel %vm1998_vm6, %v2882_v10, %v2879_v5 }
 0xbe2   : > { %v2884_v47 = vpack.c.bf16 %v2883_v11, %v2883_v11 }
 0xbe4   : > { %3589 = vmatmul.mubr.msk.bf16.vlgmr.msra.gmra.mxu1 %vm354_vm1, %v2884_v47 }
 0xbe5   : > { %3604 = vmatprep.mubr.msk.bf16.mxu1 %vm4011_vm0, %v4010_v0  ;;  %3601 = vmatpush3.bf16.msra.mxu1 %v3735_v37 }
 0xbe6   : > { %3602 = vmatprep.subr.bf16.mxu1 %v4010_v0 }
 0xbe9   : > { %3603 = vmatpush3.bf16.msra.mxu1 %v3736_v38 }
 0xca4   : > { %v2944_v13 = vpop.f32.mrf.mxu1 }
 0xca5   : > { %v2945_v14 = vadd.f32 %v3350_v12, %v2944_v13 }
 0xca6   : > { %v3590_v15 = vpop.f32.mrf.mxu1 }
 0xca7   : > { %v2950_v16 = vadd.f32 %v2945_v14, %v4481_v25 }
 0xca8   : > { %v2947_v17 = vpop.f32.mrf.mxu1 }
 0xca9   : > { %v2953_v20 = vsel %vm354_vm1, %v2950_v16, 0.0 }
 0xcaa   : > { %2954 = vadd.xlane.f32.xlu0 %v2953_v20  ;;  %v3591_v21 = vpop.f32.mrf.mxu1 }
 0xd33   : > { %v2955_v22 = vpop.xlane.xlu0 %2954 }
 0xd34   : > { %v2956_v23 = vmul.f32 0.03125, %v2955_v22 }
 0xd36   : > { %v2957_v24 = vsub.f32 %v2950_v16, %v2956_v23 }
 0xd38   : > { %v2958_v26 = vmul.f32 %v2957_v24, %v2957_v24 }
 0xd3a   : > { %v2959_v28 = vsel %vm354_vm1, %v2958_v26, 0.0 }
 0xd3b   : > { %2960 = vadd.xlane.f32.xlu1 %v2959_v28 }
 0xdc4   : > { %v2961_v31 = vpop.xlane.xlu1 %2960 }
 0xdc5   : > { %v2962_v25 = vmul.f32 0.03125, %v2961_v31 }
 0xdc7   : > { %v2963_v32 = vadd.f32 1e-05, %v2962_v25 }
 0xdc9   : > { %3771 = vrsqrt.f32 %v2963_v32 }
 0xdd6   : > { %v3772_v33 = vpop.eup %3771 }
 0xdd7   : > { %v2965_v9 = vmul.f32 %v3772_v33, %v2957_v24 }
 0xdd9   : > { %v2970_v19 = vmul.f32 %v3354_v27, %v2965_v9 }
 0xddb   : > { %v2975_v35 = vadd.f32 %v3355_v34, %v2970_v19 }
 0xddd   : > { %v2976_v36 = vpack.c.bf16 %v2975_v35, %v2975_v35 }
 0xddf   : > { %3597 = vmatmul.mubr.msk.bf16.vlgmr.msra.gmra.mxu0 %vm354_vm1, %v2976_v36 }
 0xe9f   : > { %v3036_v40 = vpop.f32.mrf.mxu0 }
 0xea0   : > { %v3037_v42 = vadd.f32 %v3356_v39, %v3036_v40 }
 0xea1   : > { %v3598_v43 = vpop.f32.mrf.mxu0 }
 0xea2   : > { %v3042_v44 = vmax.f32 %v3037_v42, 0.0 }
 0xea3   : > { %v3039_v45 = vpop.f32.mrf.mxu0 }
 0xea4   : > { %v3043_v46 = vpack.c.bf16 %v3042_v44, %v3042_v44 }
 0xea5   : > { %v3599_v48 = vpop.f32.mrf.mxu0 }
 0xea6   : > { %3605 = vmatmul.mubr.msk.bf16.vlgmr.msra.gmra.mxu1 %vm354_vm1, %v3043_v46 }
 0xf66   : > { %v3103_v50 = vpop.f32.mrf.mxu1 }
 0xf67   : > { %v3104_v51 = vadd.f32 %v3360_v49, %v3103_v50 }
 0xf68   : > { %v3606_v52 = vpop.f32.mrf.mxu1 }
 0xf69   : > { %v3109_v53 = vadd.f32 %v3104_v51, %v2975_v35 }
 0xf6a   : > { %v3106_v54 = vpop.f32.mrf.mxu1 }
 0xf6b   : > { %v3112_v0 = vsel %vm354_vm1, %v3109_v53, 0.0 }
 0xf6c   : > { %3113 = vadd.xlane.f32.xlu0 %v3112_v0  ;;  %v3607_v55 = vpop.f32.mrf.mxu1 }
 0xff5   : > { %v3114_v56 = vpop.xlane.xlu0 %3113 }
 0xff6   : > { %v3115_v57 = vmul.f32 0.03125, %v3114_v56 }
 0xff8   : > { %v3116_v58 = vsub.f32 %v3109_v53, %v3115_v57 }
 0xffa   : > { %v3117_v59 = vmul.f32 %v3116_v58, %v3116_v58 }
 0xffc   : > { %v3118_v18 = vsel %vm354_vm1, %v3117_v59, 0.0 }
 0xffd   : > { %3119 = vadd.xlane.f32.xlu0 %v3118_v18 }
0x1086   : > { %v3120_v60 = vpop.xlane.xlu0 %3119 }
0x1087   : > { %v3121_v61 = vmul.f32 0.03125, %v3120_v60 }
0x1089   : > { %v3122_v62 = vadd.f32 1e-05, %v3121_v61 }
0x108b   : > { %3773 = vrsqrt.f32 %v3122_v62 }
0x1098   : > { %v3774_v63 = vpop.eup %3773 }
0x1099   : > { %v3124_v2 = vmul.f32 %v3774_v63, %v3116_v58 }
0x109b   : > { %v3129_v7 = vmul.f32 %v3364_v1, %v3124_v2 }
0x109d   : > { %v3134_v41 = vadd.f32 %v3365_v4, %v3129_v7 }
0x109f   : > { %3135 = vst.msk [vmem:[%s324_s16] sm:$0xff] %vm354_vm1, %v3134_v41 }
0x10a0   : > { %3924 = shalt.err (!%p3921_p9)
}
0x10a1   : > { %s3925_s26 = scalar_lea.hbm %s3149_s12, 128  ;;  %s3929_s6 = scalar_lea.hbm %s4713_s29, 256 }
0x10a2   : > { %p3926_p11 = scmp.ne.s32.totalorder %s3149_s12, %s3925_s26  ;;  %p3930_p7 = scmp.lt.s32.totalorder %s3149_s12, %s4713_s29 }
0x10a3   : > { %p3931_p3 = scmp.lt.s32.totalorder %s3929_s6, %s3925_s26 }
0x10a4   : > { %p3927_p6 = pnand %p3926_p11, %p4203_p13 }
0x10a5   : > { %p3932_p1 = por %p3931_p3, %p3930_p7 }
0x10a6   : > { %p3928_p10 = pneg %p3927_p6 }
0x10a8   : > { %p3933_p4 = pnand %p3932_p1, %p3928_p10 }
0x10aa   : > { %3936 = shalt.err (!%p3933_p4)
}
0x10ab   : > { %3622 = dma.vmem_to_hbm [thread:$0]  (%p4203_p13), %s3152_s9, 128, %s3149_s12, %s3137_s11  }
0x10ac PF: > { %s4714_s14 = sld [smem:[#allocation20_spill]]  ;;  %p4717_p2 = scmp.ge.s32.totalorder %s3999_s23, 2 }
0x10ad   : > { %s4715_s27 = sld [smem:[#allocation21_spill]] }
0x10b2   : > { %s3163_s16 = sand.u32 1, %s4714_s14  }
0x10b3   : > { %p4716_p5 = scmp.ne.s32.totalorder %s4715_s27, 0  ;;  %s3164_s30 = scalar_lea.sflag [#allocation8], %s3163_s16 }
0x10b5   : > { %p3642_p0 = pnand %p4717_p2, %p4716_p5 }
0x10b7   : > { %p3643_p8 = pneg %p3642_p0 }
0x10b9   : > { %3974 = dma.done.wait (%p3643_p8), %s3164_s30, 128  }
0x10ba   : > { %3976 = vsyncadd (%p3643_p8), %s3164_s30, 4294967168  ;;  %s23_s23 = sadd.s32 1, %s3999_s23   ;;  %s4718_s18 = smov %s3983_s19 }
0x10bb   : > { %p20_p12 = scmp.ge.s32.totalorder %s23_s23, 4   ;;  %s4719_s19 = smov %s3987_s20 }
0x10bc   : > { %s4720_s20 = smov %s4215_s10  ;;  %s4721_s21 = smov %s3995_s22 }
0x10bd   : > { %s4722_s22 = smov %s4724_s24  ;;  %22 = sbr.rel (!%p20_p12) target bundleno = 11 (0xb), region = 116 }
0x10c2   :  { %3169 = vsyncpa [#allocation7], 1 }
0x10c3   :  { %3171 = vsyncpa [#allocation7 + $0x1], 1 }
0x10c4   :  { %3172 = vsyncpa [#allocation10], 1 }
0x10c5   :  { %3173 = vsyncpa [#allocation13], 1 }
0x10c6   :  { %3174 = vsyncpa [#allocation8], 1 }
0x10c7   :  { %3176 = vsyncpa [#allocation8 + $0x1], 1 }

</bundles_post_ra>
